<compile_context>
chip_gen: v7x
topology: tpu7x:2x2x1
jax: 0.10.0
libtpu: 0.0.40
codegen_flags: <defaults>
</compile_context>

<pallas_src>
import functools

import jax
import jax.numpy as jnp
from jax.experimental import pallas as pl
from jax.experimental.pallas import tpu as pltpu

D_IN = 784      # 28 * 28
D_H = 400
D_Z = 20

# Lane-aligned padded sizes.
D_IN_P = 896    # 7 * 128
D_Z_P = 64      # mu / logvar each padded to 64 -> fused encoder head is (., 128)


def _round_up(a, m):
    return (a + m - 1) // m * m


def vae_forward_kernel(
    x_ref, eps_ref,
    w1_ref, b1_ref,
    wenc_ref, benc_ref,
    w3_ref, b3_ref,
    w4_ref, b4_ref,
    recon_ref, mulv_ref,
):
    f32 = jnp.float32
    bf16 = jnp.bfloat16

    x = x_ref[...]                                                   # (tb, 896) bf16

    # encode: h1 = relu(x @ W1 + b1)     (bf16 operands, f32 accumulate)
    h1 = jnp.dot(x, w1_ref[...], preferred_element_type=f32) + b1_ref[...]
    h1 = jnp.maximum(h1, 0.0)                                        # (tb, 400) f32

    # fused fc21 | fc22 head: one MXU pass -> (tb, 128) = [mu_pad | logvar_pad]
    mulv = jnp.dot(h1.astype(bf16), wenc_ref[...],
                   preferred_element_type=f32) + benc_ref[...]
    mu = mulv[:, :D_Z_P]
    logvar = mulv[:, D_Z_P:]

    # reparameterize: z = mu + eps * exp(0.5 * logvar)   (f32 on VPU/EUP)
    std = jnp.exp(0.5 * logvar)
    z = mu + eps_ref[...] * std                                      # (tb, 64) f32

    # decode: h3 = relu(z @ W3 + b3); recon = sigmoid(h3 @ W4 + b4)
    h3 = jnp.dot(z.astype(bf16), w3_ref[...], preferred_element_type=f32) + b3_ref[...]
    h3 = jnp.maximum(h3, 0.0)
    logits = jnp.dot(h3.astype(bf16), w4_ref[...],
                     preferred_element_type=f32) + b4_ref[...]
    recon = jax.nn.sigmoid(logits)

    recon_ref[...] = recon.astype(recon_ref.dtype)
    mulv_ref[...] = mulv.astype(mulv_ref.dtype)


def prepare_params(params):
    """Pad, fuse (fc21|fc22) and cast matmul weights to bf16. Biases stay f32."""
    (w1, b1, w21, b21, w22, b22, w3, b3, w4, b4) = params
    bf16, f32 = jnp.bfloat16, jnp.float32

    # fc1: pad input dim 784 -> 896 with zero rows.
    w1p = jnp.pad(w1, ((0, D_IN_P - D_IN), (0, 0))).astype(bf16)
    b1p = b1.astype(f32)

    # Fused encoder head (400, 128): cols [0:20] = w21 (mu), [64:84] = w22 (logvar).
    wenc = jnp.zeros((D_H, 2 * D_Z_P), f32)
    wenc = wenc.at[:, :D_Z].set(w21).at[:, D_Z_P:D_Z_P + D_Z].set(w22)
    benc = jnp.zeros((1, 2 * D_Z_P), f32)
    benc = benc.at[:, :D_Z].set(b21).at[:, D_Z_P:D_Z_P + D_Z].set(b22)

    # fc3: pad latent dim 20 -> 64 with zero rows (padded z cols are exactly 0).
    w3p = jnp.pad(w3, ((0, D_Z_P - D_Z), (0, 0))).astype(bf16)
    b3p = b3.astype(f32)

    # fc4: pad output dim 784 -> 896 with zero cols.
    w4p = jnp.pad(w4, ((0, 0), (0, D_IN_P - D_IN))).astype(bf16)
    b4p = jnp.pad(b4, ((0, 0), (0, D_IN_P - D_IN))).astype(f32)

    return (w1p, b1p, wenc.astype(bf16), benc, w3p, b3p, w4p, b4p)


def vae_forward(x_img, eps, prepped, *, batch_tile=256):
    """x_img: (B, 1, 28, 28) float32 NCHW. eps: (B, 20) standard-normal noise."""
    B = x_img.shape[0]
    # Adaptive batch tile: full MXU-height tiles for large batches, minimal
    # padding for small ones; always a multiple of 8 sublanes.
    tb = min(batch_tile, _round_up(B, 8))
    Bp = _round_up(B, tb)

    x = x_img.reshape(B, D_IN)                        # == x.view(-1, 784)
    x = jnp.pad(x, ((0, Bp - B), (0, D_IN_P - D_IN))).astype(jnp.bfloat16)
    eps_p = jnp.pad(eps, ((0, Bp - B), (0, D_Z_P - D_Z))).astype(jnp.float32)

    (w1, b1, wenc, benc, w3, b3, w4, b4) = prepped
    grid = (Bp // tb,)

    def const2d(shape):
        # Full-array, grid-invariant block: weights / biases stay VMEM-resident.
        return pl.BlockSpec(shape, lambda i: (0, 0))

    in_specs = [
        pl.BlockSpec((tb, D_IN_P), lambda i: (i, 0)),          # x
        pl.BlockSpec((tb, D_Z_P), lambda i: (i, 0)),           # eps
        const2d((D_IN_P, D_H)), const2d((1, D_H)),             # fc1
        const2d((D_H, 2 * D_Z_P)), const2d((1, 2 * D_Z_P)),    # fused fc21|fc22
        const2d((D_Z_P, D_H)), const2d((1, D_H)),              # fc3
        const2d((D_H, D_IN_P)), const2d((1, D_IN_P)),          # fc4
    ]
    out_specs = [
        pl.BlockSpec((tb, D_IN_P), lambda i: (i, 0)),          # recon (padded)
        pl.BlockSpec((tb, 2 * D_Z_P), lambda i: (i, 0)),       # packed [mu|logvar]
    ]
    out_shape = (
        jax.ShapeDtypeStruct((Bp, D_IN_P), jnp.float32),
        jax.ShapeDtypeStruct((Bp, 2 * D_Z_P), jnp.float32),
    )

    recon_p, mulv = pl.pallas_call(
        vae_forward_kernel,
        grid=grid,
        in_specs=in_specs,
        out_specs=out_specs,
        out_shape=out_shape,
        compiler_params=pltpu.CompilerParams(
            dimension_semantics=("parallel",),
            vmem_limit_bytes=32 << 20,
        ),
    )(x, eps_p, w1, b1, wenc, benc, w3, b3, w4, b4)

    recon = recon_p[:B, :D_IN]
    mu = mulv[:B, :D_Z]
    logvar = mulv[:B, D_Z_P:D_Z_P + D_Z]
    return recon, mu, logvar


def init_params(key):
    """Deterministic init; Linear weights stored as (in, out) like W.T of PyTorch."""
    def linear(k, fan_in, fan_out):
        kw, kb = jax.random.split(k)
        bound = 1.0 / jnp.sqrt(fan_in)
        w = jax.random.uniform(kw, (fan_in, fan_out), jnp.float32, -bound, bound)
        b = jax.random.uniform(kb, (1, fan_out), jnp.float32, -bound, bound)
        return w, b

    k1, k2, k3, k4, k5 = jax.random.split(key, 5)
    w1, b1 = linear(k1, D_IN, D_H)     # fc1
    w21, b21 = linear(k2, D_H, D_Z)    # fc21
    w22, b22 = linear(k3, D_H, D_Z)    # fc22
    w3, b3 = linear(k4, D_Z, D_H)      # fc3
    w4, b4 = linear(k5, D_H, D_IN)     # fc4
    return (w1, b1, w21, b21, w22, b22, w3, b3, w4, b4)


def vae_forward_ref_f32(x_img, eps, params):
    """Pure-f32 JAX reference matching the PyTorch forward."""
    (w1, b1, w21, b21, w22, b22, w3, b3, w4, b4) = params
    x = x_img.reshape(x_img.shape[0], D_IN)
    h1 = jnp.maximum(x @ w1 + b1, 0.0)
    mu = h1 @ w21 + b21
    logvar = h1 @ w22 + b22
    z = mu + eps * jnp.exp(0.5 * logvar)
    h3 = jnp.maximum(z @ w3 + b3, 0.0)
    recon = jax.nn.sigmoid(h3 @ w4 + b4)
    return recon, mu, logvar


def vae_forward_ref_bf16(x_img, eps, params):
    """Reference with the kernel's precision scheme (bf16 matmul operands, f32 accum)."""
    (w1, b1, w21, b21, w22, b22, w3, b3, w4, b4) = params
    bf16, f32 = jnp.bfloat16, jnp.float32
    dot = functools.partial(jnp.dot, preferred_element_type=f32)
    x = x_img.reshape(x_img.shape[0], D_IN).astype(bf16)
    h1 = jnp.maximum(dot(x, w1.astype(bf16)) + b1, 0.0)
    mu = dot(h1.astype(bf16), w21.astype(bf16)) + b21
    logvar = dot(h1.astype(bf16), w22.astype(bf16)) + b22
    z = mu + eps * jnp.exp(0.5 * logvar)
    h3 = jnp.maximum(dot(z.astype(bf16), w3.astype(bf16)) + b3, 0.0)
    recon = jax.nn.sigmoid(dot(h3.astype(bf16), w4.astype(bf16)) + b4)
    return recon, mu, logvar


if __name__ == "__main__":
    key = jax.random.PRNGKey(0)
    kp, kx, ke = jax.random.split(key, 3)

    params = init_params(kp)
    prepped = prepare_params(params)

    B = 16
    x_img = jax.random.uniform(kx, (B, 1, 28, 28), jnp.float32)   # NCHW, like MNIST
    eps = jax.random.normal(ke, (B, D_Z), jnp.float32)            # reparam noise

    recon, mu, logvar = vae_forward(x_img, eps, prepped, batch_tile=256)
    jax.block_until_ready((recon, mu, logvar))

    # Tight check against a precision-matched (bf16 operand / f32 accum) reference.
    r_m, mu_m, lv_m = vae_forward_ref_bf16(x_img, eps, params)
    assert jnp.allclose(recon, r_m, atol=2e-3, rtol=2e-3)
    assert jnp.allclose(mu, mu_m, atol=2e-3, rtol=2e-3)
    assert jnp.allclose(logvar, lv_m, atol=2e-3, rtol=2e-3)

    # Loose sanity check against the pure-f32 reference (bf16 quantization error only).
    r_f, mu_f, lv_f = vae_forward_ref_f32(x_img, eps, params)
    assert jnp.allclose(recon, r_f, atol=1e-1, rtol=1e-1)
    assert jnp.allclose(mu, mu_f, atol=1e-1, rtol=1e-1)
    assert jnp.allclose(logvar, lv_f, atol=1e-1, rtol=1e-1)

    print("KERNEL_OK")
</pallas_src>

<mosaic_0001>
module attributes {stable_mosaic.version = 11 : i64} {
  func.func @vae_forward_kernel(%arg0: i32, %arg1: memref<16x896xbf16, #tpu.memory_space<vmem>>, %arg2: memref<16x64xf32, #tpu.memory_space<vmem>>, %arg3: memref<896x400xbf16, #tpu.memory_space<vmem>>, %arg4: memref<1x400xf32, #tpu.memory_space<vmem>>, %arg5: memref<400x128xbf16, #tpu.memory_space<vmem>>, %arg6: memref<1x128xf32, #tpu.memory_space<vmem>>, %arg7: memref<64x400xbf16, #tpu.memory_space<vmem>>, %arg8: memref<1x400xf32, #tpu.memory_space<vmem>>, %arg9: memref<400x896xbf16, #tpu.memory_space<vmem>>, %arg10: memref<1x896xf32, #tpu.memory_space<vmem>>, %arg11: memref<16x896xf32, #tpu.memory_space<vmem>>, %arg12: memref<16x128xf32, #tpu.memory_space<vmem>>) attributes {dimension_semantics = [#tpu.dimension_semantics<parallel>], iteration_bounds = array<i64: 1>, scalar_prefetch = 0 : i64, scratch_operands = 0 : i64, tpu.core_type = #tpu.core_type<tc>, window_params = [{transform_indices = @transform_0, window_bounds = array<i64: 16, 896>}, {transform_indices = @transform_1, window_bounds = array<i64: 16, 64>}, {pipeline_mode = #tpu.pipeline_mode<synchronous>, transform_indices = @transform_2, window_bounds = array<i64: 896, 400>}, {pipeline_mode = #tpu.pipeline_mode<synchronous>, transform_indices = @transform_3, window_bounds = array<i64: 1, 400>}, {pipeline_mode = #tpu.pipeline_mode<synchronous>, transform_indices = @transform_4, window_bounds = array<i64: 400, 128>}, {pipeline_mode = #tpu.pipeline_mode<synchronous>, transform_indices = @transform_5, window_bounds = array<i64: 1, 128>}, {pipeline_mode = #tpu.pipeline_mode<synchronous>, transform_indices = @transform_6, window_bounds = array<i64: 64, 400>}, {pipeline_mode = #tpu.pipeline_mode<synchronous>, transform_indices = @transform_7, window_bounds = array<i64: 1, 400>}, {pipeline_mode = #tpu.pipeline_mode<synchronous>, transform_indices = @transform_8, window_bounds = array<i64: 400, 896>}, {pipeline_mode = #tpu.pipeline_mode<synchronous>, transform_indices = @transform_9, window_bounds = array<i64: 1, 896>}, {transform_indices = @transform_10, window_bounds = array<i64: 16, 896>}, {transform_indices = @transform_11, window_bounds = array<i64: 16, 128>}]} {
    %c0 = arith.constant 0 : index
    %c0_0 = arith.constant 0 : index
    %0 = vector.load %arg1[%c0, %c0_0] : memref<16x896xbf16, #tpu.memory_space<vmem>>, vector<16x896xbf16>
    %c0_1 = arith.constant 0 : index
    %c0_2 = arith.constant 0 : index
    %1 = vector.load %arg3[%c0_1, %c0_2] : memref<896x400xbf16, #tpu.memory_space<vmem>>, vector<896x400xbf16>
    %cst = arith.constant dense<0.000000e+00> : vector<16x400xf32>
    %2 = tpu.matmul %0, %1, %cst {dimension_numbers = #tpu.dot_dimension_numbers<[1], [0], [0], [1], [0, 0, 1, 1], [], []>} : vector<16x896xbf16>, vector<896x400xbf16>, vector<16x400xf32> -> vector<16x400xf32>
    %c0_3 = arith.constant 0 : index
    %c0_4 = arith.constant 0 : index
    %3 = vector.load %arg4[%c0_3, %c0_4] : memref<1x400xf32, #tpu.memory_space<vmem>>, vector<1x400xf32>
    %4 = vector.broadcast %3 : vector<1x400xf32> to vector<16x400xf32>
    %5 = arith.addf %2, %4 : vector<16x400xf32>
    %cst_5 = arith.constant 0.000000e+00 : f32
    %6 = vector.broadcast %cst_5 : f32 to vector<16x400xf32>
    %7 = arith.maximumf %5, %6 : vector<16x400xf32>
    %8 = arith.truncf %7 : vector<16x400xf32> to vector<16x400xbf16>
    %c0_6 = arith.constant 0 : index
    %c0_7 = arith.constant 0 : index
    %9 = vector.load %arg5[%c0_6, %c0_7] : memref<400x128xbf16, #tpu.memory_space<vmem>>, vector<400x128xbf16>
    %cst_8 = arith.constant dense<0.000000e+00> : vector<16x128xf32>
    %10 = tpu.matmul %8, %9, %cst_8 {dimension_numbers = #tpu.dot_dimension_numbers<[1], [0], [0], [1], [0, 0, 1, 1], [], []>} : vector<16x400xbf16>, vector<400x128xbf16>, vector<16x128xf32> -> vector<16x128xf32>
    %c0_9 = arith.constant 0 : index
    %c0_10 = arith.constant 0 : index
    %11 = vector.load %arg6[%c0_9, %c0_10] : memref<1x128xf32, #tpu.memory_space<vmem>>, vector<1x128xf32>
    %12 = vector.broadcast %11 : vector<1x128xf32> to vector<16x128xf32>
    %13 = arith.addf %10, %12 : vector<16x128xf32>
    %14 = vector.extract_strided_slice %13 {offsets = [0, 0], sizes = [16, 64], strides = [1, 1]} : vector<16x128xf32> to vector<16x64xf32>
    %15 = vector.extract_strided_slice %13 {offsets = [0, 64], sizes = [16, 64], strides = [1, 1]} : vector<16x128xf32> to vector<16x64xf32>
    %cst_11 = arith.constant 5.000000e-01 : f32
    %16 = vector.broadcast %cst_11 : f32 to vector<16x64xf32>
    %17 = arith.mulf %16, %15 : vector<16x64xf32>
    %18 = math.exp %17 : vector<16x64xf32>
    %c0_12 = arith.constant 0 : index
    %c0_13 = arith.constant 0 : index
    %19 = vector.load %arg2[%c0_12, %c0_13] : memref<16x64xf32, #tpu.memory_space<vmem>>, vector<16x64xf32>
    %20 = arith.mulf %19, %18 : vector<16x64xf32>
    %21 = arith.addf %14, %20 : vector<16x64xf32>
    %22 = arith.truncf %21 : vector<16x64xf32> to vector<16x64xbf16>
    %c0_14 = arith.constant 0 : index
    %c0_15 = arith.constant 0 : index
    %23 = vector.load %arg7[%c0_14, %c0_15] : memref<64x400xbf16, #tpu.memory_space<vmem>>, vector<64x400xbf16>
    %cst_16 = arith.constant dense<0.000000e+00> : vector<16x400xf32>
    %24 = tpu.matmul %22, %23, %cst_16 {dimension_numbers = #tpu.dot_dimension_numbers<[1], [0], [0], [1], [0, 0, 1, 1], [], []>} : vector<16x64xbf16>, vector<64x400xbf16>, vector<16x400xf32> -> vector<16x400xf32>
    %c0_17 = arith.constant 0 : index
    %c0_18 = arith.constant 0 : index
    %25 = vector.load %arg8[%c0_17, %c0_18] : memref<1x400xf32, #tpu.memory_space<vmem>>, vector<1x400xf32>
    %26 = vector.broadcast %25 : vector<1x400xf32> to vector<16x400xf32>
    %27 = arith.addf %24, %26 : vector<16x400xf32>
    %cst_19 = arith.constant 0.000000e+00 : f32
    %28 = vector.broadcast %cst_19 : f32 to vector<16x400xf32>
    %29 = arith.maximumf %27, %28 : vector<16x400xf32>
    %30 = arith.truncf %29 : vector<16x400xf32> to vector<16x400xbf16>
    %c0_20 = arith.constant 0 : index
    %c0_21 = arith.constant 0 : index
    %31 = vector.load %arg9[%c0_20, %c0_21] : memref<400x896xbf16, #tpu.memory_space<vmem>>, vector<400x896xbf16>
    %cst_22 = arith.constant dense<0.000000e+00> : vector<16x896xf32>
    %32 = tpu.matmul %30, %31, %cst_22 {dimension_numbers = #tpu.dot_dimension_numbers<[1], [0], [0], [1], [0, 0, 1, 1], [], []>} : vector<16x400xbf16>, vector<400x896xbf16>, vector<16x896xf32> -> vector<16x896xf32>
    %c0_23 = arith.constant 0 : index
    %c0_24 = arith.constant 0 : index
    %33 = vector.load %arg10[%c0_23, %c0_24] : memref<1x896xf32, #tpu.memory_space<vmem>>, vector<1x896xf32>
    %34 = vector.broadcast %33 : vector<1x896xf32> to vector<16x896xf32>
    %35 = arith.addf %32, %34 : vector<16x896xf32>
    %36 = arith.negf %35 : vector<16x896xf32>
    %37 = math.exp %36 : vector<16x896xf32>
    %cst_25 = arith.constant 1.000000e+00 : f32
    %38 = vector.broadcast %cst_25 : f32 to vector<16x896xf32>
    %39 = arith.addf %38, %37 : vector<16x896xf32>
    %40 = arith.divf %38, %39 : vector<16x896xf32>
    %c0_26 = arith.constant 0 : index
    %c0_27 = arith.constant 0 : index
    %41 = vector.load %arg11[%c0_26, %c0_27] : memref<16x896xf32, #tpu.memory_space<vmem>>, vector<16x896xf32>
    tpu.vector_store %arg11[%c0_26, %c0_27], %40 {strides = array<i32>} : memref<16x896xf32, #tpu.memory_space<vmem>>, vector<16x896xf32>,
    %c0_28 = arith.constant 0 : index
    %c0_29 = arith.constant 0 : index
    %42 = vector.load %arg12[%c0_28, %c0_29] : memref<16x128xf32, #tpu.memory_space<vmem>>, vector<16x128xf32>
    tpu.vector_store %arg12[%c0_28, %c0_29], %13 {strides = array<i32>} : memref<16x128xf32, #tpu.memory_space<vmem>>, vector<16x128xf32>,
    return
  }
  func.func @transform_0(%arg0: i32) -> (i32, i32) {
    %c0_i32 = arith.constant 0 : i32
    %c0_i32_0 = arith.constant 0 : i32
    return %arg0, %c0_i32 : i32, i32
  }
  func.func @transform_1(%arg0: i32) -> (i32, i32) {
    %c0_i32 = arith.constant 0 : i32
    %c0_i32_0 = arith.constant 0 : i32
    return %arg0, %c0_i32 : i32, i32
  }
  func.func @transform_2(%arg0: i32) -> (i32, i32) {
    %c0_i32 = arith.constant 0 : i32
    %c0_i32_0 = arith.constant 0 : i32
    %c0_i32_1 = arith.constant 0 : i32
    return %c0_i32, %c0_i32_0 : i32, i32
  }
  func.func @transform_3(%arg0: i32) -> (i32, i32) {
    %c0_i32 = arith.constant 0 : i32
    %c0_i32_0 = arith.constant 0 : i32
    %c0_i32_1 = arith.constant 0 : i32
    return %c0_i32, %c0_i32_0 : i32, i32
  }
  func.func @transform_4(%arg0: i32) -> (i32, i32) {
    %c0_i32 = arith.constant 0 : i32
    %c0_i32_0 = arith.constant 0 : i32
    %c0_i32_1 = arith.constant 0 : i32
    return %c0_i32, %c0_i32_0 : i32, i32
  }
  func.func @transform_5(%arg0: i32) -> (i32, i32) {
    %c0_i32 = arith.constant 0 : i32
    %c0_i32_0 = arith.constant 0 : i32
    %c0_i32_1 = arith.constant 0 : i32
    return %c0_i32, %c0_i32_0 : i32, i32
  }
  func.func @transform_6(%arg0: i32) -> (i32, i32) {
    %c0_i32 = arith.constant 0 : i32
    %c0_i32_0 = arith.constant 0 : i32
    %c0_i32_1 = arith.constant 0 : i32
    return %c0_i32, %c0_i32_0 : i32, i32
  }
  func.func @transform_7(%arg0: i32) -> (i32, i32) {
    %c0_i32 = arith.constant 0 : i32
    %c0_i32_0 = arith.constant 0 : i32
    %c0_i32_1 = arith.constant 0 : i32
    return %c0_i32, %c0_i32_0 : i32, i32
  }
  func.func @transform_8(%arg0: i32) -> (i32, i32) {
    %c0_i32 = arith.constant 0 : i32
    %c0_i32_0 = arith.constant 0 : i32
    %c0_i32_1 = arith.constant 0 : i32
    return %c0_i32, %c0_i32_0 : i32, i32
  }
  func.func @transform_9(%arg0: i32) -> (i32, i32) {
    %c0_i32 = arith.constant 0 : i32
    %c0_i32_0 = arith.constant 0 : i32
    %c0_i32_1 = arith.constant 0 : i32
    return %c0_i32, %c0_i32_0 : i32, i32
  }
  func.func @transform_10(%arg0: i32) -> (i32, i32) {
    %c0_i32 = arith.constant 0 : i32
    %c0_i32_0 = arith.constant 0 : i32
    return %arg0, %c0_i32 : i32, i32
  }
  func.func @transform_11(%arg0: i32) -> (i32, i32) {
    %c0_i32 = arith.constant 0 : i32
    %c0_i32_0 = arith.constant 0 : i32
    return %arg0, %c0_i32 : i32, i32
  }
}

</mosaic_0001>

<bundles_post_ra>
// kernel: tpu_custom_call.1
= control target key start
LH: loop header
LB: loop body
LE: loop exit
PB: predicated region body
PF: predicated region fallthrough
CT: control target
= control target key end

     0   :  { %17 = vsyncpa [#allocation3], 0  ;;  %s6834_s0 = inlined_call_operand.vmem [shape: bf16[16,896], index: 0, kind: input, shape index: {}]   ;;  %s6835_s1 = inlined_call_operand.vmem [shape: f32[16,64], index: 1, kind: input, shape index: {}]   ;;  %s6836_s2 = inlined_call_operand.vmem [shape: bf16[896,400], index: 2, kind: input, shape index: {}]   ;;  %s6837_s3 = inlined_call_operand.vmem [shape: f32[1,400], index: 3, kind: input, shape index: {}]   ;;  %s6838_s4 = inlined_call_operand.vmem [shape: bf16[400,128], index: 4, kind: input, shape index: {}]   ;;  %s6839_s5 = inlined_call_operand.vmem [shape: f32[1,128], index: 5, kind: input, shape index: {}]   ;;  %s6840_s6 = inlined_call_operand.vmem [shape: bf16[64,400], index: 6, kind: input, shape index: {}]   ;;  %s6841_s7 = inlined_call_operand.vmem [shape: f32[1,400], index: 7, kind: input, shape index: {}]   ;;  %s6842_s8 = inlined_call_operand.vmem [shape: bf16[400,896], index: 8, kind: input, shape index: {}]   ;;  %s6843_s9 = inlined_call_operand.vmem [shape: f32[1,896], index: 9, kind: input, shape index: {}]   ;;  %s6844_s10 = inlined_call_operand.hbm [shape: f32[16,896], index: 10, kind: output, shape index: {0}]   ;;  %s6845_s11 = inlined_call_operand.hbm [shape: f32[16,128], index: 11, kind: output, shape index: {1}]  }
   0x1   :  { %v4529_v0 = vld [vmem:[%s6836_s2 + $0x4] ss:$16 sps:$4 sm:$0xff]   ;;  %v4531_v1 = vld [vmem:[%s6836_s2 + $0xc] ss:$16 sps:$4 sm:$0xff]   ;;  %v4533_v2 = vld [vmem:[%s6836_s2] ss:$16 sps:$4 sm:$0xff]  }
   0x2   :  { %1450 = vmatprep.subr.bf16.mxu0 %v4529_v0  ;;  %v4534_v3 = vld [vmem:[%s6836_s2 + $0x8] ss:$16 sps:$4 sm:$0xff]   ;;  %1622 = vmatprep.subr.bf16.mxu1 %v4531_v1  ;;  %v4535_v4 = vld [vmem:[%s6836_s2 + $0x24] ss:$16 sps:$4 sm:$0xff]   ;;  %v4537_v5 = vld [vmem:[%s6836_s2 + $0x2c] ss:$16 sps:$4 sm:$0xff]  }
   0x3   :  { %1451 = vmatpush1.bf16.msra.mxu0 %v4533_v2  ;;  %1623 = vmatpush1.bf16.msra.mxu1 %v4534_v3  ;;  %v4539_v6 = vld [vmem:[%s6836_s2 + $0x20] ss:$16 sps:$4 sm:$0xff]   ;;  %v4540_v7 = vld [vmem:[%s6836_s2 + $0x28] ss:$16 sps:$4 sm:$0xff]   ;;  %v4541_v8 = vld [vmem:[%s6836_s2 + $0x44] ss:$16 sps:$4 sm:$0xff]  }
   0x4   :  { %1452 = vmatprep.subr.bf16.mxu0 %v4535_v4  ;;  %1624 = vmatprep.subr.bf16.mxu1 %v4537_v5  ;;  %v4543_v9 = vld [vmem:[%s6836_s2 + $0x4c] ss:$16 sps:$4 sm:$0xff]   ;;  %v4545_v10 = vld [vmem:[%s6836_s2 + $0x40] ss:$16 sps:$4 sm:$0xff]   ;;  %v4546_v11 = vld [vmem:[%s6836_s2 + $0x48] ss:$16 sps:$4 sm:$0xff]  }
   0x5   :  { %v4547_v12 = vld [vmem:[%s6836_s2 + $0x64] ss:$16 sps:$4 sm:$0xff]   ;;  %v4549_v13 = vld [vmem:[%s6836_s2 + $0x6c] ss:$16 sps:$4 sm:$0xff]   ;;  %v4551_v14 = vld [vmem:[%s6836_s2 + $0x60] ss:$16 sps:$4 sm:$0xff]  }
   0x6   :  { %v4552_v15 = vld [vmem:[%s6836_s2 + $0x68] ss:$16 sps:$4 sm:$0xff]   ;;  %v4553_v16 = vld [vmem:[%s6836_s2 + $0x84] ss:$16 sps:$4 sm:$0xff]   ;;  %v4555_v17 = vld [vmem:[%s6836_s2 + $0x8c] ss:$16 sps:$4 sm:$0xff]  }
   0x7   :  { %1453 = vmatpush1.bf16.msra.mxu0 %v4539_v6  ;;  %1625 = vmatpush1.bf16.msra.mxu1 %v4540_v7  ;;  %v4557_v18 = vld [vmem:[%s6836_s2 + $0x80] ss:$16 sps:$4 sm:$0xff]   ;;  %v4558_v19 = vld [vmem:[%s6836_s2 + $0x88] ss:$16 sps:$4 sm:$0xff]   ;;  %v4559_v20 = vld [vmem:[%s6836_s2 + $0xa4] ss:$16 sps:$4 sm:$0xff]  }
   0x8   :  { %1454 = vmatprep.subr.bf16.mxu0 %v4541_v8  ;;  %1626 = vmatprep.subr.bf16.mxu1 %v4543_v9  ;;  %v4561_v21 = vld [vmem:[%s6836_s2 + $0xac] ss:$16 sps:$4 sm:$0xff]   ;;  %v4563_v22 = vld [vmem:[%s6836_s2 + $0xa0] ss:$16 sps:$4 sm:$0xff]   ;;  %v4564_v23 = vld [vmem:[%s6836_s2 + $0xa8] ss:$16 sps:$4 sm:$0xff]  }
   0x9   :  { %v4565_v24 = vld [vmem:[%s6836_s2 + $0xc4] ss:$16 sps:$4 sm:$0xff]   ;;  %v4567_v25 = vld [vmem:[%s6836_s2 + $0xcc] ss:$16 sps:$4 sm:$0xff]   ;;  %v4569_v26 = vld [vmem:[%s6836_s2 + $0xc0] ss:$16 sps:$4 sm:$0xff]  }
   0xa   :  { %v4570_v27 = vld [vmem:[%s6836_s2 + $0xc8] ss:$16 sps:$4 sm:$0xff]   ;;  %v4571_v28 = vld [vmem:[%s6836_s2 + $0xe4] ss:$16 sps:$4 sm:$0xff]   ;;  %v4573_v29 = vld [vmem:[%s6836_s2 + $0xec] ss:$16 sps:$4 sm:$0xff]  }
   0xb   :  { %1455 = vmatpush1.bf16.msra.mxu0 %v4545_v10  ;;  %1627 = vmatpush1.bf16.msra.mxu1 %v4546_v11  ;;  %v4575_v30 = vld [vmem:[%s6836_s2 + $0xe0] ss:$16 sps:$4 sm:$0xff]   ;;  %v4576_v31 = vld [vmem:[%s6836_s2 + $0xe8] ss:$16 sps:$4 sm:$0xff]   ;;  %v4577_v32 = vld [vmem:[%s6836_s2 + $0x104] ss:$16 sps:$4 sm:$0xff]  }
   0xc   :  { %1456 = vmatprep.subr.bf16.mxu0 %v4547_v12  ;;  %1628 = vmatprep.subr.bf16.mxu1 %v4549_v13  ;;  %v4579_v33 = vld [vmem:[%s6836_s2 + $0x10c] ss:$16 sps:$4 sm:$0xff]   ;;  %v4581_v34 = vld [vmem:[%s6836_s2 + $0x100] ss:$16 sps:$4 sm:$0xff]   ;;  %v4582_v35 = vld [vmem:[%s6836_s2 + $0x108] ss:$16 sps:$4 sm:$0xff]  }
   0xd   :  { %v4583_v36 = vld [vmem:[%s6836_s2 + $0x124] ss:$16 sps:$4 sm:$0xff]   ;;  %v4585_v37 = vld [vmem:[%s6836_s2 + $0x12c] ss:$16 sps:$4 sm:$0xff]   ;;  %v4587_v38 = vld [vmem:[%s6836_s2 + $0x120] ss:$16 sps:$4 sm:$0xff]  }
   0xe   :  { %v4588_v39 = vld [vmem:[%s6836_s2 + $0x128] ss:$16 sps:$4 sm:$0xff]   ;;  %v4589_v40 = vld [vmem:[%s6836_s2 + $0x144] ss:$16 sps:$4 sm:$0xff]   ;;  %v4591_v41 = vld [vmem:[%s6836_s2 + $0x14c] ss:$16 sps:$4 sm:$0xff]  }
   0xf   :  { %1457 = vmatpush1.bf16.msra.mxu0 %v4551_v14  ;;  %1629 = vmatpush1.bf16.msra.mxu1 %v4552_v15  ;;  %v4593_v42 = vld [vmem:[%s6836_s2 + $0x140] ss:$16 sps:$4 sm:$0xff]   ;;  %v4594_v43 = vld [vmem:[%s6836_s2 + $0x148] ss:$16 sps:$4 sm:$0xff]   ;;  %v4595_v44 = vld [vmem:[%s6836_s2 + $0x164] ss:$16 sps:$4 sm:$0xff]  }
  0x10   :  { %1458 = vmatprep.subr.bf16.mxu0 %v4553_v16  ;;  %1630 = vmatprep.subr.bf16.mxu1 %v4555_v17  ;;  %v4597_v45 = vld [vmem:[%s6836_s2 + $0x16c] ss:$16 sps:$4 sm:$0xff]   ;;  %v4599_v46 = vld [vmem:[%s6836_s2 + $0x160] ss:$16 sps:$4 sm:$0xff]   ;;  %v4600_v47 = vld [vmem:[%s6836_s2 + $0x168] ss:$16 sps:$4 sm:$0xff]  }
  0x11   :  { %v4627_v48 = vld [vmem:[%s6834_s0 + $0x4] ss:$28 sps:$4 sm:$0xff]   ;;  %v4603_v50 = vld [vmem:[%s6836_s2 + $0x18c] ss:$16 sps:$4 sm:$0xff]   ;;  %v4606_v52 = vld [vmem:[%s6836_s2 + $0x188] ss:$16 sps:$4 sm:$0xff]  }
  0x12   :  { %v4601_v49 = vld [vmem:[%s6836_s2 + $0x184] ss:$16 sps:$4 sm:$0xff]   ;;  %1482 = vmatprep.mubr.bf16.mxu0 %v4627_v48  ;;  %1654 = vmatprep.mubr.bf16.mxu1 %v4627_v48  ;;  %v4605_v51 = vld [vmem:[%s6836_s2 + $0x180] ss:$16 sps:$4 sm:$0xff]   ;;  %v4609_v54 = vld [vmem:[%s6836_s2 + $0x1ac] ss:$16 sps:$4 sm:$0xff]  }
  0x13   :  { %1459 = vmatpush1.bf16.msra.mxu0 %v4557_v18  ;;  %1631 = vmatpush1.bf16.msra.mxu1 %v4558_v19  ;;  %v4607_v53 = vld [vmem:[%s6836_s2 + $0x1a4] ss:$16 sps:$4 sm:$0xff]   ;;  %v4611_v55 = vld [vmem:[%s6836_s2 + $0x1a0] ss:$16 sps:$4 sm:$0xff]   ;;  %v4612_v56 = vld [vmem:[%s6836_s2 + $0x1a8] ss:$16 sps:$4 sm:$0xff]  }
  0x14   :  { %1460 = vmatprep.subr.bf16.mxu0 %v4559_v20  ;;  %1632 = vmatprep.subr.bf16.mxu1 %v4561_v21  ;;  %v4613_v57 = vld [vmem:[%s6836_s2 + $0x1c4] ss:$16 sps:$4 sm:$0xff]   ;;  %v4615_v58 = vld [vmem:[%s6836_s2 + $0x1cc] ss:$16 sps:$4 sm:$0xff]   ;;  %v4617_v59 = vld [vmem:[%s6836_s2 + $0x1c0] ss:$16 sps:$4 sm:$0xff]  }
  0x15   :  { %v4618_v60 = vld [vmem:[%s6836_s2 + $0x1c8] ss:$16 sps:$4 sm:$0xff]   ;;  %v4619_v61 = vld [vmem:[%s6836_s2 + $0x1e4] ss:$16 sps:$4 sm:$0xff]   ;;  %v4621_v62 = vld [vmem:[%s6836_s2 + $0x1ec] ss:$16 sps:$4 sm:$0xff]  }
  0x16   :  { %v4623_v63 = vld [vmem:[%s6836_s2 + $0x1e0] ss:$16 sps:$4 sm:$0xff]   ;;  %v4624_v0 = vld [vmem:[%s6836_s2 + $0x1e8] ss:$16 sps:$4 sm:$0xff]   ;;  %v4630_v1 = vld [vmem:[%s6836_s2 + $0x204] ss:$16 sps:$4 sm:$0xff]  }
  0x17   :  { %1461 = vmatpush1.bf16.msra.mxu0 %v4563_v22  ;;  %1633 = vmatpush1.bf16.msra.mxu1 %v4564_v23  ;;  %v4633_v2 = vld [vmem:[%s6836_s2 + $0x20c] ss:$16 sps:$4 sm:$0xff]   ;;  %v4628_v4 = vld [vmem:[%s6836_s2 + $0x200] ss:$16 sps:$4 sm:$0xff]   ;;  %v4631_v5 = vld [vmem:[%s6836_s2 + $0x208] ss:$16 sps:$4 sm:$0xff]  }
  0x18   :  { %1462 = vmatprep.subr.bf16.mxu0 %v4565_v24  ;;  %1634 = vmatprep.subr.bf16.mxu1 %v4567_v25  ;;  %v4625_v3 = vld [vmem:[%s6834_s0] ss:$28 sps:$4 sm:$0xff]   ;;  %v4636_v6 = vld [vmem:[%s6836_s2 + $0x224] ss:$16 sps:$4 sm:$0xff]   ;;  %v4637_v9 = vld [vmem:[%s6836_s2 + $0x228] ss:$16 sps:$4 sm:$0xff]  }
  0x19   :  { %v4639_v7 = vld [vmem:[%s6836_s2 + $0x22c] ss:$16 sps:$4 sm:$0xff]   ;;  %v4634_v8 = vld [vmem:[%s6836_s2 + $0x220] ss:$16 sps:$4 sm:$0xff]   ;;  %v4642_v10 = vld [vmem:[%s6836_s2 + $0x244] ss:$16 sps:$4 sm:$0xff]  }
  0x1a   :  { %v4645_v11 = vld [vmem:[%s6836_s2 + $0x24c] ss:$16 sps:$4 sm:$0xff]   ;;  %v4640_v12 = vld [vmem:[%s6836_s2 + $0x240] ss:$16 sps:$4 sm:$0xff]   ;;  %v4643_v13 = vld [vmem:[%s6836_s2 + $0x248] ss:$16 sps:$4 sm:$0xff]  }
  0x1b   :  { %1463 = vmatpush1.bf16.msra.mxu0 %v4569_v26  ;;  %1635 = vmatpush1.bf16.msra.mxu1 %v4570_v27  ;;  %v4648_v14 = vld [vmem:[%s6836_s2 + $0x264] ss:$16 sps:$4 sm:$0xff]   ;;  %v4651_v15 = vld [vmem:[%s6836_s2 + $0x26c] ss:$16 sps:$4 sm:$0xff]   ;;  %v4646_v16 = vld [vmem:[%s6836_s2 + $0x260] ss:$16 sps:$4 sm:$0xff]  }
  0x1c   :  { %1464 = vmatprep.subr.bf16.mxu0 %v4571_v28  ;;  %1636 = vmatprep.subr.bf16.mxu1 %v4573_v29  ;;  %v4649_v17 = vld [vmem:[%s6836_s2 + $0x268] ss:$16 sps:$4 sm:$0xff]   ;;  %v4654_v18 = vld [vmem:[%s6836_s2 + $0x284] ss:$16 sps:$4 sm:$0xff]   ;;  %v4657_v19 = vld [vmem:[%s6836_s2 + $0x28c] ss:$16 sps:$4 sm:$0xff]  }
  0x1d   :  { %v4652_v20 = vld [vmem:[%s6836_s2 + $0x280] ss:$16 sps:$4 sm:$0xff]   ;;  %v4655_v21 = vld [vmem:[%s6836_s2 + $0x288] ss:$16 sps:$4 sm:$0xff]   ;;  %v4660_v22 = vld [vmem:[%s6836_s2 + $0x2a4] ss:$16 sps:$4 sm:$0xff]  }
  0x1e   :  { %v4663_v23 = vld [vmem:[%s6836_s2 + $0x2ac] ss:$16 sps:$4 sm:$0xff]   ;;  %v4658_v24 = vld [vmem:[%s6836_s2 + $0x2a0] ss:$16 sps:$4 sm:$0xff]   ;;  %v4661_v25 = vld [vmem:[%s6836_s2 + $0x2a8] ss:$16 sps:$4 sm:$0xff]  }
  0x1f   :  { %1465 = vmatpush1.bf16.msra.mxu0 %v4575_v30  ;;  %1637 = vmatpush1.bf16.msra.mxu1 %v4576_v31  ;;  %v4666_v26 = vld [vmem:[%s6836_s2 + $0x2c4] ss:$16 sps:$4 sm:$0xff]   ;;  %v4669_v27 = vld [vmem:[%s6836_s2 + $0x2cc] ss:$16 sps:$4 sm:$0xff]   ;;  %v4664_v28 = vld [vmem:[%s6836_s2 + $0x2c0] ss:$16 sps:$4 sm:$0xff]  }
  0x20   :  { %1466 = vmatprep.subr.bf16.mxu0 %v4577_v32  ;;  %1638 = vmatprep.subr.bf16.mxu1 %v4579_v33  ;;  %v4667_v29 = vld [vmem:[%s6836_s2 + $0x2c8] ss:$16 sps:$4 sm:$0xff]   ;;  %v4672_v31 = vld [vmem:[%s6836_s2 + $0x2e4] ss:$16 sps:$4 sm:$0xff]   ;;  %v4675_v32 = vld [vmem:[%s6836_s2 + $0x2ec] ss:$16 sps:$4 sm:$0xff]  }
  0x21   :  { %v4726_v30 = vld [vmem:[%s6834_s0 + $0xc] ss:$28 sps:$4 sm:$0xff]   ;;  %v4670_v33 = vld [vmem:[%s6836_s2 + $0x2e0] ss:$16 sps:$4 sm:$0xff]  }
  0x22   :  { %v4699_v48 = vld [vmem:[%s6836_s2 + $0x36c] ss:$16 sps:$4 sm:$0xff]  }
  0x23   :  { %1467 = vmatpush1.bf16.msra.mxu0 %v4581_v34  ;;  %1639 = vmatpush1.bf16.msra.mxu1 %v4582_v35  ;;  %v4673_v34 = vld [vmem:[%s6836_s2 + $0x2e8] ss:$16 sps:$4 sm:$0xff]   ;;  %v4678_v35 = vld [vmem:[%s6836_s2 + $0x304] ss:$16 sps:$4 sm:$0xff]  }
  0x24   :  { %1468 = vmatprep.subr.bf16.mxu0 %v4583_v36  ;;  %1640 = vmatprep.subr.bf16.mxu1 %v4585_v37  ;;  %v4681_v36 = vld [vmem:[%s6836_s2 + $0x30c] ss:$16 sps:$4 sm:$0xff]   ;;  %v4676_v37 = vld [vmem:[%s6836_s2 + $0x300] ss:$16 sps:$4 sm:$0xff]  }
  0x27   :  { %1469 = vmatpush1.bf16.msra.mxu0 %v4587_v38  ;;  %1641 = vmatpush1.bf16.msra.mxu1 %v4588_v39  ;;  %v4679_v38 = vld [vmem:[%s6836_s2 + $0x308] ss:$16 sps:$4 sm:$0xff]   ;;  %v4684_v39 = vld [vmem:[%s6836_s2 + $0x324] ss:$16 sps:$4 sm:$0xff]  }
  0x28   :  { %1470 = vmatprep.subr.bf16.mxu0 %v4589_v40  ;;  %1642 = vmatprep.subr.bf16.mxu1 %v4591_v41  ;;  %v4687_v40 = vld [vmem:[%s6836_s2 + $0x32c] ss:$16 sps:$4 sm:$0xff]   ;;  %v4682_v41 = vld [vmem:[%s6836_s2 + $0x320] ss:$16 sps:$4 sm:$0xff]  }
  0x2b   :  { %1471 = vmatpush1.bf16.msra.mxu0 %v4593_v42  ;;  %1643 = vmatpush1.bf16.msra.mxu1 %v4594_v43  ;;  %v4685_v42 = vld [vmem:[%s6836_s2 + $0x328] ss:$16 sps:$4 sm:$0xff]   ;;  %v4690_v43 = vld [vmem:[%s6836_s2 + $0x344] ss:$16 sps:$4 sm:$0xff]  }
  0x2c   :  { %1472 = vmatprep.subr.bf16.mxu0 %v4595_v44  ;;  %1644 = vmatprep.subr.bf16.mxu1 %v4597_v45  ;;  %v4693_v44 = vld [vmem:[%s6836_s2 + $0x34c] ss:$16 sps:$4 sm:$0xff]   ;;  %v4688_v45 = vld [vmem:[%s6836_s2 + $0x340] ss:$16 sps:$4 sm:$0xff]  }
  0x2f   :  { %1473 = vmatpush1.bf16.msra.mxu0 %v4599_v46  ;;  %1645 = vmatpush1.bf16.msra.mxu1 %v4600_v47  ;;  %v4691_v46 = vld [vmem:[%s6836_s2 + $0x348] ss:$16 sps:$4 sm:$0xff]   ;;  %v4696_v47 = vld [vmem:[%s6836_s2 + $0x364] ss:$16 sps:$4 sm:$0xff]  }
  0x30   :  { %1474 = vmatprep.subr.bf16.mxu0 %v4601_v49  ;;  %1646 = vmatprep.subr.bf16.mxu1 %v4603_v50  ;;  %v4694_v49 = vld [vmem:[%s6836_s2 + $0x360] ss:$16 sps:$4 sm:$0xff]   ;;  %v4697_v50 = vld [vmem:[%s6836_s2 + $0x368] ss:$16 sps:$4 sm:$0xff]  }
  0x33   :  { %1475 = vmatpush1.bf16.msra.mxu0 %v4605_v51  ;;  %1647 = vmatpush1.bf16.msra.mxu1 %v4606_v52  ;;  %v4702_v51 = vld [vmem:[%s6836_s2 + $0x384] ss:$16 sps:$4 sm:$0xff]   ;;  %v4705_v52 = vld [vmem:[%s6836_s2 + $0x38c] ss:$16 sps:$4 sm:$0xff]  }
  0x34   :  { %1476 = vmatprep.subr.bf16.mxu0 %v4607_v53  ;;  %1648 = vmatprep.subr.bf16.mxu1 %v4609_v54  ;;  %v4700_v53 = vld [vmem:[%s6836_s2 + $0x380] ss:$16 sps:$4 sm:$0xff]   ;;  %v4703_v54 = vld [vmem:[%s6836_s2 + $0x388] ss:$16 sps:$4 sm:$0xff]  }
  0x37   :  { %1477 = vmatpush1.bf16.msra.mxu0 %v4611_v55  ;;  %1649 = vmatpush1.bf16.msra.mxu1 %v4612_v56  ;;  %v4708_v55 = vld [vmem:[%s6836_s2 + $0x3a4] ss:$16 sps:$4 sm:$0xff]   ;;  %v4711_v56 = vld [vmem:[%s6836_s2 + $0x3ac] ss:$16 sps:$4 sm:$0xff]  }
  0x38   :  { %1478 = vmatprep.subr.bf16.mxu0 %v4613_v57  ;;  %1650 = vmatprep.subr.bf16.mxu1 %v4615_v58  ;;  %v4706_v57 = vld [vmem:[%s6836_s2 + $0x3a0] ss:$16 sps:$4 sm:$0xff]   ;;  %v4709_v58 = vld [vmem:[%s6836_s2 + $0x3a8] ss:$16 sps:$4 sm:$0xff]  }
  0x3b   :  { %1479 = vmatpush1.bf16.msra.mxu0 %v4617_v59  ;;  %1651 = vmatpush1.bf16.msra.mxu1 %v4618_v60  ;;  %v4714_v59 = vld [vmem:[%s6836_s2 + $0x3c4] ss:$16 sps:$4 sm:$0xff]   ;;  %v4717_v60 = vld [vmem:[%s6836_s2 + $0x3cc] ss:$16 sps:$4 sm:$0xff]  }
  0x3c   :  { %1480 = vmatprep.subr.bf16.mxu0 %v4619_v61  ;;  %1652 = vmatprep.subr.bf16.mxu1 %v4621_v62  ;;  %v4712_v61 = vld [vmem:[%s6836_s2 + $0x3c0] ss:$16 sps:$4 sm:$0xff]   ;;  %v4715_v62 = vld [vmem:[%s6836_s2 + $0x3c8] ss:$16 sps:$4 sm:$0xff]  }
  0x3f   :  { %1481 = vmatpush1.bf16.msra.mxu0 %v4623_v63  ;;  %1653 = vmatpush1.bf16.msra.mxu1 %v4624_v0  ;;  %v4720_v63 = vld [vmem:[%s6836_s2 + $0x3e4] ss:$16 sps:$4 sm:$0xff]   ;;  %v4723_v0 = vld [vmem:[%s6836_s2 + $0x3ec] ss:$16 sps:$4 sm:$0xff]  }
  0x40   :  { %1493 = vmatprep.subr.bf16.mxu0 %v4630_v1  ;;  %1665 = vmatprep.subr.bf16.mxu1 %v4633_v2  ;;  %v4718_v1 = vld [vmem:[%s6836_s2 + $0x3e0] ss:$16 sps:$4 sm:$0xff]   ;;  %v4721_v2 = vld [vmem:[%s6836_s2 + $0x3e8] ss:$16 sps:$4 sm:$0xff]  }
  0x42   :  { %1483 = vmatmul.mubr.bf16.vlgmr.msra.gmra.mrb[0].mxu0 %v4625_v3  ;;  %1655 = vmatmul.mubr.bf16.vlgmr.msra.gmra.mrb[0].mxu1 %v4625_v3  ;;  %v4729_v3 = vld [vmem:[%s6836_s2 + $0x404] ss:$16 sps:$4 sm:$0xff]  }
  0x43   :  { %1494 = vmatpush1.bf16.msra.mxu0 %v4628_v4  ;;  %1666 = vmatpush1.bf16.msra.mxu1 %v4631_v5  ;;  %v4732_v4 = vld [vmem:[%s6836_s2 + $0x40c] ss:$16 sps:$4 sm:$0xff]   ;;  %v4724_v5 = vld [vmem:[%s6834_s0 + $0x8] ss:$28 sps:$4 sm:$0xff]  }
  0x44   :  { %1495 = vmatprep.subr.bf16.mxu0 %v4636_v6  ;;  %1667 = vmatprep.subr.bf16.mxu1 %v4639_v7  ;;  %v4727_v6 = vld [vmem:[%s6836_s2 + $0x400] ss:$16 sps:$4 sm:$0xff]   ;;  %v4730_v7 = vld [vmem:[%s6836_s2 + $0x408] ss:$16 sps:$4 sm:$0xff]  }
  0x45   :  { %1525 = vmatprep.mubr.bf16.mxu0 %v4726_v30  ;;  %1697 = vmatprep.mubr.bf16.mxu1 %v4726_v30  ;;  %v4768_v30 = vld [vmem:[%s6836_s2 + $0x4cc] ss:$16 sps:$4 sm:$0xff]  }
  0x47   :  { %1496 = vmatpush1.bf16.msra.mxu0 %v4634_v8  ;;  %1668 = vmatpush1.bf16.msra.mxu1 %v4637_v9  ;;  %v4735_v8 = vld [vmem:[%s6836_s2 + $0x424] ss:$16 sps:$4 sm:$0xff]   ;;  %v4738_v9 = vld [vmem:[%s6836_s2 + $0x42c] ss:$16 sps:$4 sm:$0xff]  }
  0x48   :  { %1497 = vmatprep.subr.bf16.mxu0 %v4642_v10  ;;  %1669 = vmatprep.subr.bf16.mxu1 %v4645_v11  ;;  %v4733_v10 = vld [vmem:[%s6836_s2 + $0x420] ss:$16 sps:$4 sm:$0xff]   ;;  %v4736_v11 = vld [vmem:[%s6836_s2 + $0x428] ss:$16 sps:$4 sm:$0xff]  }
  0x4b   :  { %1498 = vmatpush1.bf16.msra.mxu0 %v4640_v12  ;;  %1670 = vmatpush1.bf16.msra.mxu1 %v4643_v13  ;;  %v4825_v12 = vld [vmem:[%s6834_s0 + $0x14] ss:$28 sps:$4 sm:$0xff]  }
  0x4c   :  { %1499 = vmatprep.subr.bf16.mxu0 %v4648_v14  ;;  %1671 = vmatprep.subr.bf16.mxu1 %v4651_v15  ;;  %v4741_v13 = vld [vmem:[%s6836_s2 + $0x444] ss:$16 sps:$4 sm:$0xff]   ;;  %v4744_v14 = vld [vmem:[%s6836_s2 + $0x44c] ss:$16 sps:$4 sm:$0xff]   ;;  %v4739_v15 = vld [vmem:[%s6836_s2 + $0x440] ss:$16 sps:$4 sm:$0xff]  }
  0x4f   :  { %1500 = vmatpush1.bf16.msra.mxu0 %v4646_v16  ;;  %1672 = vmatpush1.bf16.msra.mxu1 %v4649_v17  ;;  %v4742_v16 = vld [vmem:[%s6836_s2 + $0x448] ss:$16 sps:$4 sm:$0xff]   ;;  %v4747_v17 = vld [vmem:[%s6836_s2 + $0x464] ss:$16 sps:$4 sm:$0xff]  }
  0x50   :  { %1501 = vmatprep.subr.bf16.mxu0 %v4654_v18  ;;  %1673 = vmatprep.subr.bf16.mxu1 %v4657_v19  ;;  %v4750_v18 = vld [vmem:[%s6836_s2 + $0x46c] ss:$16 sps:$4 sm:$0xff]   ;;  %v4745_v19 = vld [vmem:[%s6836_s2 + $0x460] ss:$16 sps:$4 sm:$0xff]  }
  0x53   :  { %1502 = vmatpush1.bf16.msra.mxu0 %v4652_v20  ;;  %1674 = vmatpush1.bf16.msra.mxu1 %v4655_v21  ;;  %v4748_v20 = vld [vmem:[%s6836_s2 + $0x468] ss:$16 sps:$4 sm:$0xff]   ;;  %v4753_v21 = vld [vmem:[%s6836_s2 + $0x484] ss:$16 sps:$4 sm:$0xff]  }
  0x54   :  { %1503 = vmatprep.subr.bf16.mxu0 %v4660_v22  ;;  %1675 = vmatprep.subr.bf16.mxu1 %v4663_v23  ;;  %v4756_v22 = vld [vmem:[%s6836_s2 + $0x48c] ss:$16 sps:$4 sm:$0xff]   ;;  %v4751_v23 = vld [vmem:[%s6836_s2 + $0x480] ss:$16 sps:$4 sm:$0xff]  }
  0x57   :  { %1504 = vmatpush1.bf16.msra.mxu0 %v4658_v24  ;;  %1676 = vmatpush1.bf16.msra.mxu1 %v4661_v25  ;;  %v4754_v24 = vld [vmem:[%s6836_s2 + $0x488] ss:$16 sps:$4 sm:$0xff]   ;;  %v4759_v25 = vld [vmem:[%s6836_s2 + $0x4a4] ss:$16 sps:$4 sm:$0xff]  }
  0x58   :  { %1505 = vmatprep.subr.bf16.mxu0 %v4666_v26  ;;  %1677 = vmatprep.subr.bf16.mxu1 %v4669_v27  ;;  %v4762_v26 = vld [vmem:[%s6836_s2 + $0x4ac] ss:$16 sps:$4 sm:$0xff]   ;;  %v4757_v27 = vld [vmem:[%s6836_s2 + $0x4a0] ss:$16 sps:$4 sm:$0xff]  }
  0x5b   :  { %1506 = vmatpush1.bf16.msra.mxu0 %v4664_v28  ;;  %1678 = vmatpush1.bf16.msra.mxu1 %v4667_v29  ;;  %v4760_v28 = vld [vmem:[%s6836_s2 + $0x4a8] ss:$16 sps:$4 sm:$0xff]   ;;  %v4765_v29 = vld [vmem:[%s6836_s2 + $0x4c4] ss:$16 sps:$4 sm:$0xff]  }
  0x5c   :  { %1507 = vmatprep.subr.bf16.mxu0 %v4672_v31  ;;  %1679 = vmatprep.subr.bf16.mxu1 %v4675_v32  ;;  %v4763_v31 = vld [vmem:[%s6836_s2 + $0x4c0] ss:$16 sps:$4 sm:$0xff]   ;;  %v4766_v32 = vld [vmem:[%s6836_s2 + $0x4c8] ss:$16 sps:$4 sm:$0xff]  }
  0x5f   :  { %1508 = vmatpush1.bf16.msra.mxu0 %v4670_v33  ;;  %1680 = vmatpush1.bf16.msra.mxu1 %v4673_v34  ;;  %v4771_v33 = vld [vmem:[%s6836_s2 + $0x4e4] ss:$16 sps:$4 sm:$0xff]   ;;  %v4774_v34 = vld [vmem:[%s6836_s2 + $0x4ec] ss:$16 sps:$4 sm:$0xff]  }
  0x60   :  { %1509 = vmatprep.subr.bf16.mxu0 %v4678_v35  ;;  %1681 = vmatprep.subr.bf16.mxu1 %v4681_v36  ;;  %v4769_v35 = vld [vmem:[%s6836_s2 + $0x4e0] ss:$16 sps:$4 sm:$0xff]   ;;  %v4772_v36 = vld [vmem:[%s6836_s2 + $0x4e8] ss:$16 sps:$4 sm:$0xff]  }
  0x63   :  { %1510 = vmatpush1.bf16.msra.mxu0 %v4676_v37  ;;  %1682 = vmatpush1.bf16.msra.mxu1 %v4679_v38  ;;  %v4777_v37 = vld [vmem:[%s6836_s2 + $0x504] ss:$16 sps:$4 sm:$0xff]   ;;  %v4780_v38 = vld [vmem:[%s6836_s2 + $0x50c] ss:$16 sps:$4 sm:$0xff]  }
  0x64   :  { %1511 = vmatprep.subr.bf16.mxu0 %v4684_v39  ;;  %1683 = vmatprep.subr.bf16.mxu1 %v4687_v40  ;;  %v4775_v39 = vld [vmem:[%s6836_s2 + $0x500] ss:$16 sps:$4 sm:$0xff]   ;;  %v4778_v40 = vld [vmem:[%s6836_s2 + $0x508] ss:$16 sps:$4 sm:$0xff]  }
  0x67   :  { %1512 = vmatpush1.bf16.msra.mxu0 %v4682_v41  ;;  %1684 = vmatpush1.bf16.msra.mxu1 %v4685_v42  ;;  %v4783_v41 = vld [vmem:[%s6836_s2 + $0x524] ss:$16 sps:$4 sm:$0xff]   ;;  %v4786_v42 = vld [vmem:[%s6836_s2 + $0x52c] ss:$16 sps:$4 sm:$0xff]  }
  0x68   :  { %1513 = vmatprep.subr.bf16.mxu0 %v4690_v43  ;;  %1685 = vmatprep.subr.bf16.mxu1 %v4693_v44  ;;  %v4781_v43 = vld [vmem:[%s6836_s2 + $0x520] ss:$16 sps:$4 sm:$0xff]   ;;  %v4784_v44 = vld [vmem:[%s6836_s2 + $0x528] ss:$16 sps:$4 sm:$0xff]  }
  0x6b   :  { %1514 = vmatpush1.bf16.msra.mxu0 %v4688_v45  ;;  %1686 = vmatpush1.bf16.msra.mxu1 %v4691_v46  ;;  %v4789_v45 = vld [vmem:[%s6836_s2 + $0x544] ss:$16 sps:$4 sm:$0xff]   ;;  %v4792_v46 = vld [vmem:[%s6836_s2 + $0x54c] ss:$16 sps:$4 sm:$0xff]  }
  0x6c   :  { %1515 = vmatprep.subr.bf16.mxu0 %v4696_v47  ;;  %1687 = vmatprep.subr.bf16.mxu1 %v4699_v48  ;;  %v4787_v47 = vld [vmem:[%s6836_s2 + $0x540] ss:$16 sps:$4 sm:$0xff]   ;;  %v4790_v48 = vld [vmem:[%s6836_s2 + $0x548] ss:$16 sps:$4 sm:$0xff]  }
  0x6f   :  { %1516 = vmatpush1.bf16.msra.mxu0 %v4694_v49  ;;  %1688 = vmatpush1.bf16.msra.mxu1 %v4697_v50  ;;  %v4795_v49 = vld [vmem:[%s6836_s2 + $0x564] ss:$16 sps:$4 sm:$0xff]   ;;  %v4798_v50 = vld [vmem:[%s6836_s2 + $0x56c] ss:$16 sps:$4 sm:$0xff]  }
  0x70   :  { %1517 = vmatprep.subr.bf16.mxu0 %v4702_v51  ;;  %1689 = vmatprep.subr.bf16.mxu1 %v4705_v52  ;;  %v4793_v51 = vld [vmem:[%s6836_s2 + $0x560] ss:$16 sps:$4 sm:$0xff]   ;;  %v4796_v52 = vld [vmem:[%s6836_s2 + $0x568] ss:$16 sps:$4 sm:$0xff]  }
  0x73   :  { %1518 = vmatpush1.bf16.msra.mxu0 %v4700_v53  ;;  %1690 = vmatpush1.bf16.msra.mxu1 %v4703_v54  ;;  %v4801_v53 = vld [vmem:[%s6836_s2 + $0x584] ss:$16 sps:$4 sm:$0xff]   ;;  %v4804_v54 = vld [vmem:[%s6836_s2 + $0x58c] ss:$16 sps:$4 sm:$0xff]  }
  0x74   :  { %1519 = vmatprep.subr.bf16.mxu0 %v4708_v55  ;;  %1691 = vmatprep.subr.bf16.mxu1 %v4711_v56  ;;  %v4799_v55 = vld [vmem:[%s6836_s2 + $0x580] ss:$16 sps:$4 sm:$0xff]   ;;  %v4802_v56 = vld [vmem:[%s6836_s2 + $0x588] ss:$16 sps:$4 sm:$0xff]  }
  0x77   :  { %1520 = vmatpush1.bf16.msra.mxu0 %v4706_v57  ;;  %1692 = vmatpush1.bf16.msra.mxu1 %v4709_v58  ;;  %v4807_v57 = vld [vmem:[%s6836_s2 + $0x5a4] ss:$16 sps:$4 sm:$0xff]   ;;  %v4810_v58 = vld [vmem:[%s6836_s2 + $0x5ac] ss:$16 sps:$4 sm:$0xff]  }
  0x78   :  { %1521 = vmatprep.subr.bf16.mxu0 %v4714_v59  ;;  %1693 = vmatprep.subr.bf16.mxu1 %v4717_v60  ;;  %v4805_v59 = vld [vmem:[%s6836_s2 + $0x5a0] ss:$16 sps:$4 sm:$0xff]   ;;  %v4808_v60 = vld [vmem:[%s6836_s2 + $0x5a8] ss:$16 sps:$4 sm:$0xff]  }
  0x7b   :  { %1522 = vmatpush1.bf16.msra.mxu0 %v4712_v61  ;;  %1694 = vmatpush1.bf16.msra.mxu1 %v4715_v62  ;;  %v4813_v61 = vld [vmem:[%s6836_s2 + $0x5c4] ss:$16 sps:$4 sm:$0xff]   ;;  %v4816_v62 = vld [vmem:[%s6836_s2 + $0x5cc] ss:$16 sps:$4 sm:$0xff]  }
  0x7c   :  { %1523 = vmatprep.subr.bf16.mxu0 %v4720_v63  ;;  %1695 = vmatprep.subr.bf16.mxu1 %v4723_v0  ;;  %v4811_v63 = vld [vmem:[%s6836_s2 + $0x5c0] ss:$16 sps:$4 sm:$0xff]   ;;  %v4814_v0 = vld [vmem:[%s6836_s2 + $0x5c8] ss:$16 sps:$4 sm:$0xff]  }
  0x7f   :  { %1524 = vmatpush1.bf16.msra.mxu0 %v4718_v1  ;;  %1696 = vmatpush1.bf16.msra.mxu1 %v4721_v2  ;;  %v4819_v1 = vld [vmem:[%s6836_s2 + $0x5e4] ss:$16 sps:$4 sm:$0xff]   ;;  %v4822_v2 = vld [vmem:[%s6836_s2 + $0x5ec] ss:$16 sps:$4 sm:$0xff]  }
  0x80   :  { %1536 = vmatprep.subr.bf16.mxu0 %v4729_v3  ;;  %1708 = vmatprep.subr.bf16.mxu1 %v4732_v4  ;;  %v4817_v3 = vld [vmem:[%s6836_s2 + $0x5e0] ss:$16 sps:$4 sm:$0xff]   ;;  %v4820_v4 = vld [vmem:[%s6836_s2 + $0x5e8] ss:$16 sps:$4 sm:$0xff]  }
  0x82   :  { %1526 = vmatmul.mubr.bf16.vlgmr.msra.gmra.mrb[0].mxu0 %v4724_v5  ;;  %1698 = vmatmul.mubr.bf16.vlgmr.msra.gmra.mrb[0].mxu1 %v4724_v5  ;;  %v4828_v5 = vld [vmem:[%s6836_s2 + $0x604] ss:$16 sps:$4 sm:$0xff]  }
  0x83   :  { %1537 = vmatpush1.bf16.msra.mxu0 %v4727_v6  ;;  %1709 = vmatpush1.bf16.msra.mxu1 %v4730_v7  ;;  %v4831_v6 = vld [vmem:[%s6836_s2 + $0x60c] ss:$16 sps:$4 sm:$0xff]  }
  0x84   :  { %1538 = vmatprep.subr.bf16.mxu0 %v4735_v8  ;;  %1710 = vmatprep.subr.bf16.mxu1 %v4738_v9  ;;  %v4823_v7 = vld [vmem:[%s6834_s0 + $0x10] ss:$28 sps:$4 sm:$0xff]   ;;  %v4829_v9 = vld [vmem:[%s6836_s2 + $0x608] ss:$16 sps:$4 sm:$0xff]  }
  0x85   :  { %1568 = vmatprep.mubr.bf16.mxu0 %v4825_v12  ;;  %1740 = vmatprep.mubr.bf16.mxu1 %v4825_v12  ;;  %v4826_v8 = vld [vmem:[%s6836_s2 + $0x600] ss:$16 sps:$4 sm:$0xff]  }
  0x86   :  { %v4832_v12 = vld [vmem:[%s6836_s2 + $0x620] ss:$16 sps:$4 sm:$0xff]  }
  0x87   :  { %1539 = vmatpush1.bf16.msra.mxu0 %v4733_v10  ;;  %1711 = vmatpush1.bf16.msra.mxu1 %v4736_v11  ;;  %v4834_v10 = vld [vmem:[%s6836_s2 + $0x624] ss:$16 sps:$4 sm:$0xff]   ;;  %v4837_v11 = vld [vmem:[%s6836_s2 + $0x62c] ss:$16 sps:$4 sm:$0xff]  }
  0x88   :  { %1540 = vmatprep.subr.bf16.mxu0 %v4741_v13  ;;  %1712 = vmatprep.subr.bf16.mxu1 %v4744_v14  ;;  %v4835_v13 = vld [vmem:[%s6836_s2 + $0x628] ss:$16 sps:$4 sm:$0xff]   ;;  %v4840_v14 = vld [vmem:[%s6836_s2 + $0x644] ss:$16 sps:$4 sm:$0xff]  }
  0x8b   :  { %1541 = vmatpush1.bf16.msra.mxu0 %v4739_v15  ;;  %1713 = vmatpush1.bf16.msra.mxu1 %v4742_v16  ;;  %v4843_v15 = vld [vmem:[%s6836_s2 + $0x64c] ss:$16 sps:$4 sm:$0xff]   ;;  %v4838_v16 = vld [vmem:[%s6836_s2 + $0x640] ss:$16 sps:$4 sm:$0xff]  }
  0x8c   :  { %1542 = vmatprep.subr.bf16.mxu0 %v4747_v17  ;;  %1714 = vmatprep.subr.bf16.mxu1 %v4750_v18  ;;  %v4841_v17 = vld [vmem:[%s6836_s2 + $0x648] ss:$16 sps:$4 sm:$0xff]   ;;  %v5282_v18 = vmov 0  }
  0x8f   :  { %1543 = vmatpush1.bf16.msra.mxu0 %v4745_v19  ;;  %1715 = vmatpush1.bf16.msra.mxu1 %v4748_v20  ;;  %v4846_v19 = vld [vmem:[%s6836_s2 + $0x664] ss:$16 sps:$4 sm:$0xff]   ;;  %v4849_v20 = vld [vmem:[%s6836_s2 + $0x66c] ss:$16 sps:$4 sm:$0xff]  }
  0x90   :  { %1544 = vmatprep.subr.bf16.mxu0 %v4753_v21  ;;  %1716 = vmatprep.subr.bf16.mxu1 %v4756_v22  ;;  %v4844_v21 = vld [vmem:[%s6836_s2 + $0x660] ss:$16 sps:$4 sm:$0xff]   ;;  %v4847_v22 = vld [vmem:[%s6836_s2 + $0x668] ss:$16 sps:$4 sm:$0xff]  }
  0x93   :  { %1545 = vmatpush1.bf16.msra.mxu0 %v4751_v23  ;;  %1717 = vmatpush1.bf16.msra.mxu1 %v4754_v24  ;;  %v4852_v23 = vld [vmem:[%s6836_s2 + $0x684] ss:$16 sps:$4 sm:$0xff]   ;;  %v4855_v24 = vld [vmem:[%s6836_s2 + $0x68c] ss:$16 sps:$4 sm:$0xff]  }
  0x94   :  { %1546 = vmatprep.subr.bf16.mxu0 %v4759_v25  ;;  %1718 = vmatprep.subr.bf16.mxu1 %v4762_v26  ;;  %v4850_v25 = vld [vmem:[%s6836_s2 + $0x680] ss:$16 sps:$4 sm:$0xff]   ;;  %v4853_v26 = vld [vmem:[%s6836_s2 + $0x688] ss:$16 sps:$4 sm:$0xff]  }
  0x97   :  { %1547 = vmatpush1.bf16.msra.mxu0 %v4757_v27  ;;  %1719 = vmatpush1.bf16.msra.mxu1 %v4760_v28  ;;  %v4858_v27 = vld [vmem:[%s6836_s2 + $0x6a4] ss:$16 sps:$4 sm:$0xff]   ;;  %v4861_v28 = vld [vmem:[%s6836_s2 + $0x6ac] ss:$16 sps:$4 sm:$0xff]  }
  0x98   :  { %1548 = vmatprep.subr.bf16.mxu0 %v4765_v29  ;;  %1720 = vmatprep.subr.bf16.mxu1 %v4768_v30  ;;  %v4856_v29 = vld [vmem:[%s6836_s2 + $0x6a0] ss:$16 sps:$4 sm:$0xff]   ;;  %v4859_v30 = vld [vmem:[%s6836_s2 + $0x6a8] ss:$16 sps:$4 sm:$0xff]  }
  0x9b   :  { %1549 = vmatpush1.bf16.msra.mxu0 %v4763_v31  ;;  %1721 = vmatpush1.bf16.msra.mxu1 %v4766_v32  ;;  %v4864_v31 = vld [vmem:[%s6836_s2 + $0x6c4] ss:$16 sps:$4 sm:$0xff]   ;;  %v4867_v32 = vld [vmem:[%s6836_s2 + $0x6cc] ss:$16 sps:$4 sm:$0xff]  }
  0x9c   :  { %1550 = vmatprep.subr.bf16.mxu0 %v4771_v33  ;;  %1722 = vmatprep.subr.bf16.mxu1 %v4774_v34  ;;  %v4862_v33 = vld [vmem:[%s6836_s2 + $0x6c0] ss:$16 sps:$4 sm:$0xff]   ;;  %v4865_v34 = vld [vmem:[%s6836_s2 + $0x6c8] ss:$16 sps:$4 sm:$0xff]  }
  0x9f   :  { %1551 = vmatpush1.bf16.msra.mxu0 %v4769_v35  ;;  %1723 = vmatpush1.bf16.msra.mxu1 %v4772_v36  ;;  %v4870_v35 = vld [vmem:[%s6836_s2 + $0x6e4] ss:$16 sps:$4 sm:$0xff]   ;;  %v4873_v36 = vld [vmem:[%s6836_s2 + $0x6ec] ss:$16 sps:$4 sm:$0xff]  }
  0xa0   :  { %1552 = vmatprep.subr.bf16.mxu0 %v4777_v37  ;;  %1724 = vmatprep.subr.bf16.mxu1 %v4780_v38  ;;  %v4868_v37 = vld [vmem:[%s6836_s2 + $0x6e0] ss:$16 sps:$4 sm:$0xff]   ;;  %v4871_v38 = vld [vmem:[%s6836_s2 + $0x6e8] ss:$16 sps:$4 sm:$0xff]  }
  0xa3   :  { %1553 = vmatpush1.bf16.msra.mxu0 %v4775_v39  ;;  %1725 = vmatpush1.bf16.msra.mxu1 %v4778_v40  ;;  %v4876_v39 = vld [vmem:[%s6838_s4 + $0x40] sm:$0xff]   ;;  %v4874_v40 = vld [vmem:[%s6834_s0 + $0x18] ss:$28 sps:$4 sm:$0xff]  }
  0xa4   :  { %1554 = vmatprep.subr.bf16.mxu0 %v4783_v41  ;;  %1726 = vmatprep.subr.bf16.mxu1 %v4786_v42  ;;  %v4875_v41 = vld [vmem:[%s6838_s4 + $0x80] sm:$0xff]  }
  0xa5   :  { %v4877_v42 = vld [vmem:[%s6838_s4] sm:$0xff]  }
  0xa7   :  { %1555 = vmatpush1.bf16.msra.mxu0 %v4781_v43  ;;  %1727 = vmatpush1.bf16.msra.mxu1 %v4784_v44  ;;  %v4879_v43 = vld [vmem:[%s6838_s4 + $0x48] sm:$0xff]  }
  0xa8   :  { %1556 = vmatprep.subr.bf16.mxu0 %v4789_v45  ;;  %1728 = vmatprep.subr.bf16.mxu1 %v4792_v46  ;;  %v4878_v44 = vld [vmem:[%s6838_s4 + $0x88] sm:$0xff]   ;;  %v4882_v46 = vld [vmem:[%s6838_s4 + $0x50] sm:$0xff]  }
  0xa9   :  { %v4880_v45 = vld [vmem:[%s6838_s4 + $0x8] sm:$0xff]  }
  0xab   :  { %1557 = vmatpush1.bf16.msra.mxu0 %v4787_v47  ;;  %1729 = vmatpush1.bf16.msra.mxu1 %v4790_v48  ;;  %v4881_v47 = vld [vmem:[%s6838_s4 + $0x90] sm:$0xff]  }
  0xac   :  { %1558 = vmatprep.subr.bf16.mxu0 %v4795_v49  ;;  %1730 = vmatprep.subr.bf16.mxu1 %v4798_v50  ;;  %v4883_v48 = vld [vmem:[%s6838_s4 + $0x10] sm:$0xff]   ;;  %v4885_v49 = vld [vmem:[%s6838_s4 + $0x58] sm:$0xff]  }
  0xad   :  { %v4884_v50 = vld [vmem:[%s6838_s4 + $0x98] sm:$0xff]  }
  0xaf   :  { %1559 = vmatpush1.bf16.msra.mxu0 %v4793_v51  ;;  %1731 = vmatpush1.bf16.msra.mxu1 %v4796_v52  ;;  %v4886_v51 = vld [vmem:[%s6838_s4 + $0x18] sm:$0xff]   ;;  %v4888_v52 = vld [vmem:[%s6838_s4 + $0x60] sm:$0xff]  }
  0xb0   :  { %1560 = vmatprep.subr.bf16.mxu0 %v4801_v53  ;;  %1732 = vmatprep.subr.bf16.mxu1 %v4804_v54  ;;  %v4887_v53 = vld [vmem:[%s6838_s4 + $0xa0] sm:$0xff]  }
  0xb1   :  { %v4889_v54 = vld [vmem:[%s6838_s4 + $0x20] sm:$0xff]  }
  0xb3   :  { %1561 = vmatpush1.bf16.msra.mxu0 %v4799_v55  ;;  %1733 = vmatpush1.bf16.msra.mxu1 %v4802_v56  ;;  %v4891_v55 = vld [vmem:[%s6838_s4 + $0x68] sm:$0xff]  }
  0xb4   :  { %1562 = vmatprep.subr.bf16.mxu0 %v4807_v57  ;;  %1734 = vmatprep.subr.bf16.mxu1 %v4810_v58  ;;  %v4890_v56 = vld [vmem:[%s6838_s4 + $0xa8] sm:$0xff]  }
  0xb7   :  { %1563 = vmatpush1.bf16.msra.mxu0 %v4805_v59  ;;  %1735 = vmatpush1.bf16.msra.mxu1 %v4808_v60 }
  0xb8   :  { %1564 = vmatprep.subr.bf16.mxu0 %v4813_v61  ;;  %1736 = vmatprep.subr.bf16.mxu1 %v4816_v62 }
  0xbb   :  { %1565 = vmatpush1.bf16.msra.mxu0 %v4811_v63  ;;  %1737 = vmatpush1.bf16.msra.mxu1 %v4814_v0 }
  0xbc   :  { %1566 = vmatprep.subr.bf16.mxu0 %v4819_v1  ;;  %1738 = vmatprep.subr.bf16.mxu1 %v4822_v2 }
  0xbf   :  { %1567 = vmatpush1.bf16.msra.mxu0 %v4817_v3  ;;  %1739 = vmatpush1.bf16.msra.mxu1 %v4820_v4 }
  0xc0   :  { %1579 = vmatprep.subr.bf16.mxu0 %v4828_v5  ;;  %1751 = vmatprep.subr.bf16.mxu1 %v4831_v6 }
  0xc2   :  { %1569 = vmatmul.mubr.bf16.vlgmr.msra.gmra.mrb[0].mxu0 %v4823_v7  ;;  %1741 = vmatmul.mubr.bf16.vlgmr.msra.gmra.mrb[0].mxu1 %v4823_v7 }
  0xc3   :  { %1580 = vmatpush1.bf16.msra.mxu0 %v4826_v8  ;;  %1752 = vmatpush1.bf16.msra.mxu1 %v4829_v9 }
  0xc4   :  { %1581 = vmatprep.subr.bf16.mxu0 %v4834_v10  ;;  %1753 = vmatprep.subr.bf16.mxu1 %v4837_v11 }
  0xc5   :  { %1611 = vmatprep.mubr.bf16.mxu0 %v5282_v18  ;;  %1783 = vmatprep.mubr.bf16.mxu1 %v5282_v18 }
  0xc7   :  { %1582 = vmatpush1.bf16.msra.mxu0 %v4832_v12  ;;  %1754 = vmatpush1.bf16.msra.mxu1 %v4835_v13 }
  0xc8   :  { %1583 = vmatprep.subr.bf16.mxu0 %v4840_v14  ;;  %1755 = vmatprep.subr.bf16.mxu1 %v4843_v15 }
  0xcb   :  { %1584 = vmatpush1.bf16.msra.mxu0 %v4838_v16  ;;  %1756 = vmatpush1.bf16.msra.mxu1 %v4841_v17 }
  0xcc   :  { %1585 = vmatprep.subr.bf16.mxu0 %v4846_v19  ;;  %1757 = vmatprep.subr.bf16.mxu1 %v4849_v20 }
  0xcf   :  { %1586 = vmatpush1.bf16.msra.mxu0 %v4844_v21  ;;  %1758 = vmatpush1.bf16.msra.mxu1 %v4847_v22 }
  0xd0   :  { %1587 = vmatprep.subr.bf16.mxu0 %v4852_v23  ;;  %1759 = vmatprep.subr.bf16.mxu1 %v4855_v24 }
  0xd3   :  { %1588 = vmatpush1.bf16.msra.mxu0 %v4850_v25  ;;  %1760 = vmatpush1.bf16.msra.mxu1 %v4853_v26 }
  0xd4   :  { %1589 = vmatprep.subr.bf16.mxu0 %v4858_v27  ;;  %1761 = vmatprep.subr.bf16.mxu1 %v4861_v28 }
  0xd7   :  { %1590 = vmatpush1.bf16.msra.mxu0 %v4856_v29  ;;  %1762 = vmatpush1.bf16.msra.mxu1 %v4859_v30 }
  0xd8   :  { %1591 = vmatprep.subr.bf16.mxu0 %v4864_v31  ;;  %1763 = vmatprep.subr.bf16.mxu1 %v4867_v32 }
  0xdb   :  { %1592 = vmatpush1.bf16.msra.mxu0 %v4862_v33  ;;  %1764 = vmatpush1.bf16.msra.mxu1 %v4865_v34 }
  0xdc   :  { %1593 = vmatprep.subr.bf16.mxu0 %v4870_v35  ;;  %1765 = vmatprep.subr.bf16.mxu1 %v4873_v36 }
  0xdf   :  { %1594 = vmatpush1.bf16.msra.mxu0 %v4868_v37  ;;  %1766 = vmatpush1.bf16.msra.mxu1 %v4871_v38 }
  0xe0   :  { %2058 = vmatprep.subr.bf16.mxu1 %v5282_v18  ;;  %4421 = vmatprep.subr.bf16.mxu0 %v4876_v39 }
  0xe2   :  { %1612 = vmatmul.mubr.bf16.vlgmr.msra.gmra.mrb[0].mxu0 %v4874_v40  ;;  %1784 = vmatmul.mubr.bf16.vlgmr.msra.gmra.mrb[0].mxu1 %v4874_v40 }
  0xe3   :  { %2059 = vmatpush1.bf16.msra.mxu1 %v4875_v41  ;;  %4422 = vmatpush3.bf16.msra.mxu0 %v4877_v42 }
  0xe4   :  { %2060 = vmatprep.subr.bf16.mxu1 %v5282_v18  ;;  %4423 = vmatprep.subr.bf16.mxu0 %v4879_v43 }
  0xe7   :  { %2061 = vmatpush1.bf16.msra.mxu1 %v4878_v44  ;;  %4424 = vmatpush3.bf16.msra.mxu0 %v4880_v45 }
  0xe8   :  { %2062 = vmatprep.subr.bf16.mxu1 %v5282_v18  ;;  %4425 = vmatprep.subr.bf16.mxu0 %v4882_v46 }
  0xeb   :  { %2063 = vmatpush1.bf16.msra.mxu1 %v4881_v47  ;;  %4426 = vmatpush3.bf16.msra.mxu0 %v4883_v48 }
  0xec   :  { %2064 = vmatprep.subr.bf16.mxu1 %v5282_v18  ;;  %4427 = vmatprep.subr.bf16.mxu0 %v4885_v49 }
  0xef   :  { %2065 = vmatpush1.bf16.msra.mxu1 %v4884_v50  ;;  %4428 = vmatpush3.bf16.msra.mxu0 %v4886_v51 }
  0xf0   :  { %2066 = vmatprep.subr.bf16.mxu1 %v5282_v18  ;;  %4429 = vmatprep.subr.bf16.mxu0 %v4888_v52 }
  0xf3   :  { %2067 = vmatpush1.bf16.msra.mxu1 %v4887_v53  ;;  %4430 = vmatpush3.bf16.msra.mxu0 %v4889_v54 }
  0xf4   :  { %2068 = vmatprep.subr.bf16.mxu1 %v5282_v18  ;;  %4431 = vmatprep.subr.bf16.mxu0 %v4891_v55 }
  0xf7   :  { %2069 = vmatpush1.bf16.msra.mxu1 %v4890_v56 }
  0xf8   :  { %2070 = vmatprep.subr.bf16.mxu1 %v5282_v18 }
  0xf9   :  { %18 = vsyncpa [#allocation5], 0  ;;  %v4892_v57 = vld [vmem:[%s6838_s4 + $0x28] sm:$0xff]   ;;  %v4893_v58 = vld [vmem:[%s6838_s4 + $0xb0] sm:$0xff]   ;;  %v274_v1 = vlaneseq  ;;  %vm2013_vm0 = vcmask 130048   ;;  %s5283_s2 = smov 64  }
  0xfa   :  { %4432 = vmatpush3.bf16.msra.mxu0 %v4892_v57  ;;  %v4894_v59 = vld [vmem:[%s6838_s4 + $0x70] sm:$0xff]   ;;  %v4896_v61 = vld [vmem:[%s6838_s4 + $0xb8] sm:$0xff]   ;;  %v4899_v0 = vld [vmem:[%s6838_s4 + $0xc0] sm:$0xff]   ;;  %vm2238_vm1 = vcmask 523264  }
  0xfb   :  { %2071 = vmatpush1.bf16.msra.mxu1 %v4893_v58  ;;  %v4895_v60 = vld [vmem:[%s6838_s4 + $0x30] sm:$0xff]   ;;  %4433 = vmatprep.subr.bf16.mxu0 %v4894_v59  ;;  %v4897_v62 = vld [vmem:[%s6838_s4 + $0x78] sm:$0xff]   ;;  %v6129_v2 = vshrl.u32 %v274_v1, 7  ;;  %v272_v5 = vld [vmem:[%s6837_s3] sm:$0xf] }
  0xfc   :  { %2072 = vmatprep.subr.bf16.mxu1 %v5282_v18  ;;  %v4898_v63 = vld [vmem:[%s6838_s4 + $0x38] sm:$0xff]   ;;  %v4900_v41 = vld [vmem:[%s6840_s6] ss:$16 sps:$4 sm:$0xff]   ;;  %v4902_v42 = vld [vmem:[%s6840_s6 + $0x4] ss:$16 sps:$4 sm:$0xff]  }
  0xfd   :  { %v6132_v3 = vsub.s32 0, %v6129_v2  ;;  %v6135_v4 = vsub.s32 2, %v6129_v2  ;;  %v6141_v6 = vsub.s32 1, %v6129_v2  ;;  %v6144_v7 = vsub.s32 3, %v6129_v2  ;;  %v4905_v43 = vld [vmem:[%s6840_s6 + $0x24] ss:$16 sps:$4 sm:$0xff]  }
  0xfe   :  { %4434 = vmatpush3.bf16.msra.mxu0 %v4895_v60  ;;  %v4903_v44 = vld [vmem:[%s6840_s6 + $0x20] ss:$16 sps:$4 sm:$0xff]  }
  0xff   :  { %2073 = vmatpush1.bf16.msra.mxu1 %v4896_v61  ;;  %4435 = vmatprep.subr.bf16.mxu0 %v4897_v62  ;;  %v277_v8 = vrot.slane %v272_v5, %v6132_v3  ;;  %v285_v9 = vrot.slane %v272_v5, %v6135_v4  ;;  %v281_v10 = vrot.slane %v272_v5, %v6141_v6  ;;  %v4183_v47 = vld [vmem:[%s6839_s5] ss:$0 sm:$0xff]  ;;  %v4908_v61 = vld [vmem:[%s6840_s6 + $0x44] ss:$16 sps:$4 sm:$0xff]  }
 0x100   :  { %2074 = vmatprep.subr.bf16.mxu1 %v5282_v18  ;;  %v289_v11 = vrot.slane %v272_v5, %v6144_v7  ;;  %v4911_v5 = vld [vmem:[%s6840_s6 + $0x64] ss:$16 sps:$4 sm:$0xff]  }
 0x102   :  { %4436 = vmatpush3.bf16.msra.mxu0 %v4898_v63 }
 0x103   :  { %2075 = vmatpush1.bf16.msra.mxu1 %v4899_v0  ;;  %v4906_v0 = vld [vmem:[%s6840_s6 + $0x40] ss:$16 sps:$4 sm:$0xff]  }
 0x104   :  { %2242 = vmatprep.subr.bf16.mxu1 %v4902_v42 }
 0x1b5   :  { %v1613_v12 = vpop.f32.mrb[0].mxu0  ;;  %v1785_v13 = vpop.f32.mrb[0].mxu1 }
 0x1b6   :  { %v4465_v14 = vadd.f32 %v1613_v12, %v277_v8  ;;  %v4469_v15 = vadd.f32 %v1785_v13, %v285_v9  ;;  %v1615_v16 = vpop.f32.mrb[1].mxu0  ;;  %v1787_v17 = vpop.f32.mrb[1].mxu1  ;;  %v4924_v12 = vld [vmem:[%s6842_s8] ss:$28 sps:$4 sm:$0xff]  }
 0x1b7   :  { %v4466_v19 = vadd.f32 %v1615_v16, %v281_v10  ;;  %v4470_v20 = vadd.f32 %v1787_v17, %v289_v11  ;;  %v1617_v21 = vpop.f32.mrb[2].mxu0  ;;  %v1789_v22 = vpop.f32.mrb[2].mxu1  ;;  %v4926_v13 = vld [vmem:[%s6842_s8 + $0x4] ss:$28 sps:$4 sm:$0xff]   ;;  %v4938_v16 = vld [vmem:[%s6842_s8 + $0x74] ss:$28 sps:$4 sm:$0xff]  }
 0x1b8   :  { %v4467_v23 = vadd.f32 %v1617_v21, %v277_v8  ;;  %v4471_v24 = vadd.f32 %v1789_v22, %v285_v9  ;;  %v1619_v25 = vpop.f32.mrb[3].mxu0  ;;  %v1791_v26 = vpop.f32.mrb[3].mxu1  ;;  %v1794_v29 = vmax.f32 %v4465_v14, 0.0  ;;  %v1796_v30 = vmax.f32 %v4469_v15, 0.0  ;;  %v4909_v8 = vld [vmem:[%s6840_s6 + $0x60] ss:$16 sps:$4 sm:$0xff]   ;;  %3480 = vmatprep.subr.bf16.mxu0 %v4926_v13 }
 0x1b9   :  { %v4468_v27 = vadd.f32 %v1619_v25, %v281_v10  ;;  %v4472_v28 = vadd.f32 %v1791_v26, %v289_v11  ;;  %v1795_v33 = vmax.f32 %v4466_v19, 0.0  ;;  %v1797_v34 = vmax.f32 %v4470_v20, 0.0  ;;  %v4914_v9 = vld [vmem:[%s6840_s6 + $0xc] ss:$16 sps:$4 sm:$0xff]   ;;  %v4930_v15 = vld [vmem:[%s6842_s8 + $0x38] ss:$28 sps:$4 sm:$0xff]  }
 0x1ba   :  { %v1798_v31 = vmax.f32 %v4467_v23, 0.0  ;;  %v1800_v32 = vmax.f32 %v4471_v24, 0.0  ;;  %v4932_v14 = vld [vmem:[%s6842_s8 + $0x3c] ss:$28 sps:$4 sm:$0xff]   ;;  %v4936_v17 = vld [vmem:[%s6842_s8 + $0x70] ss:$28 sps:$4 sm:$0xff]  }
 0x1bb   :  { %v1799_v35 = vmax.f32 %v4468_v27, 0.0  ;;  %v1801_v36 = vmax.f32 %v4472_v28, 0.0  ;;  %v4944_v19 = vld [vmem:[%s6842_s8 + $0xac] ss:$28 sps:$4 sm:$0xff]   ;;  %v4950_v21 = vld [vmem:[%s6842_s8 + $0xe4] ss:$28 sps:$4 sm:$0xff]  }
 0x1bc   :  { %v1802_v37 = vpack.c.bf16 %v1798_v31, %v1794_v29  ;;  %v1804_v38 = vpack.c.bf16 %v1800_v32, %v1796_v30  ;;  %v4942_v20 = vld [vmem:[%s6842_s8 + $0xa8] ss:$28 sps:$4 sm:$0xff]   ;;  %v4948_v22 = vld [vmem:[%s6842_s8 + $0xe0] ss:$28 sps:$4 sm:$0xff]   ;;  %v4954_v24 = vld [vmem:[%s6842_s8 + $0x118] ss:$28 sps:$4 sm:$0xff]  }
 0x1bd   :  { %v1803_v39 = vpack.c.bf16 %v1799_v35, %v1795_v33  ;;  %v1805_v40 = vpack.c.bf16 %v1801_v36, %v1797_v34  ;;  %v4956_v23 = vld [vmem:[%s6842_s8 + $0x11c] ss:$28 sps:$4 sm:$0xff]   ;;  %v4962_v25 = vld [vmem:[%s6842_s8 + $0x154] ss:$28 sps:$4 sm:$0xff]   ;;  %v4968_v27 = vld [vmem:[%s6842_s8 + $0x18c] ss:$28 sps:$4 sm:$0xff]  }
 0x1be   :  { %v4960_v26 = vld [vmem:[%s6842_s8 + $0x150] ss:$28 sps:$4 sm:$0xff]   ;;  %v4966_v28 = vld [vmem:[%s6842_s8 + $0x188] ss:$28 sps:$4 sm:$0xff]   ;;  %v4972_v30 = vld [vmem:[%s6842_s8 + $0x1c0] ss:$28 sps:$4 sm:$0xff]  }
 0x1bf   :  { %2049 = vmatprep.mubr.bf16.mxu0 %v1803_v39  ;;  %4209 = vmatprep.mubr.msk.bf16.mxu1 %vm2013_vm0, %v1805_v40  ;;  %v4974_v29 = vld [vmem:[%s6842_s8 + $0x1c4] ss:$28 sps:$4 sm:$0xff]   ;;  %v4980_v31 = vld [vmem:[%s6842_s8 + $0x1fc] ss:$28 sps:$4 sm:$0xff]   ;;  %v4986_v33 = vld [vmem:[%s6842_s8 + $0x234] ss:$28 sps:$4 sm:$0xff]  }
 0x1c0   :  { %2050 = vmatmul.mubr.bf16.vlgmr.msra.gmra.mrb[4].mxu0 %v1802_v37  ;;  %2091 = vmatmul.mubr.bf16.vlgmr.msra.gmra.mrb[4].mxu1 %v1804_v38  ;;  %v4978_v32 = vld [vmem:[%s6842_s8 + $0x1f8] ss:$28 sps:$4 sm:$0xff]   ;;  %v4984_v34 = vld [vmem:[%s6842_s8 + $0x230] ss:$28 sps:$4 sm:$0xff]   ;;  %v4990_v36 = vld [vmem:[%s6842_s8 + $0x268] ss:$28 sps:$4 sm:$0xff]  }
 0x1c1   :  { %2274 = vmatprep.mubr.bf16.mxu1 %v5282_v18  ;;  %2243 = vmatpush1.bf16.msra.mxu1 %v4900_v41  ;;  %v4992_v35 = vld [vmem:[%s6842_s8 + $0x26c] ss:$28 sps:$4 sm:$0xff]   ;;  %v4998_v37 = vld [vmem:[%s6842_s8 + $0x2a4] ss:$28 sps:$4 sm:$0xff]   ;;  %v5004_v39 = vld [vmem:[%s6842_s8 + $0x2dc] ss:$28 sps:$4 sm:$0xff]  }
 0x1c2   :  { %2244 = vmatprep.subr.bf16.mxu1 %v4905_v43  ;;  %3481 = vmatpush1.bf16.msra.mxu0 %v4924_v12  ;;  %v4996_v38 = vld [vmem:[%s6842_s8 + $0x2a0] ss:$28 sps:$4 sm:$0xff]   ;;  %v5002_v40 = vld [vmem:[%s6842_s8 + $0x2d8] ss:$28 sps:$4 sm:$0xff]   ;;  %v2106_v43 = vld [vmem:[%s6835_s1 + $0x8] sm:$0xff] }
 0x1c3   :  { %3482 = vmatprep.subr.bf16.mxu0 %v4932_v14  ;;  %v2105_v41 = vld [vmem:[%s6835_s1] sm:$0xff]  ;;  %v4971_v12 = vld [vmem:[%s6842_s8 + $0x194] ss:$28 sps:$4 sm:$0xff]   ;;  %v4977_v14 = vld [vmem:[%s6842_s8 + $0x1cc] ss:$28 sps:$4 sm:$0xff]  }
 0x1c4   :  { %v4969_v13 = vld [vmem:[%s6842_s8 + $0x190] ss:$28 sps:$4 sm:$0xff]  }
 0x1c5   :  { %2245 = vmatpush1.bf16.msra.mxu1 %v4903_v44 }
 0x1c6   :  { %2246 = vmatprep.subr.bf16.mxu1 %v4908_v61  ;;  %3483 = vmatpush1.bf16.msra.mxu0 %v4930_v15  ;;  %v4941_v61 = vld [vmem:[%s6842_s8 + $0x7c] ss:$28 sps:$4 sm:$0xff]   ;;  %v4975_v15 = vld [vmem:[%s6842_s8 + $0x1c8] ss:$28 sps:$4 sm:$0xff]  }
 0x1c7   :  { %3484 = vmatprep.subr.bf16.mxu0 %v4938_v16  ;;  %v4983_v16 = vld [vmem:[%s6842_s8 + $0x204] ss:$28 sps:$4 sm:$0xff]  }
 0x1c9   :  { %2247 = vmatpush1.bf16.msra.mxu1 %v4906_v0  ;;  %v4945_v0 = vld [vmem:[%s6842_s8 + $0xb0] ss:$28 sps:$4 sm:$0xff]  }
 0x1ca   :  { %2248 = vmatprep.subr.bf16.mxu1 %v4911_v5  ;;  %3485 = vmatpush1.bf16.msra.mxu0 %v4936_v17  ;;  %v4951_v5 = vld [vmem:[%s6842_s8 + $0xe8] ss:$28 sps:$4 sm:$0xff]   ;;  %v4981_v17 = vld [vmem:[%s6842_s8 + $0x200] ss:$28 sps:$4 sm:$0xff]  }
 0x1cb   :  { %3486 = vmatprep.subr.bf16.mxu0 %v4944_v19  ;;  %v4989_v19 = vld [vmem:[%s6842_s8 + $0x23c] ss:$28 sps:$4 sm:$0xff]  }
 0x1cd   :  { %2249 = vmatpush1.bf16.msra.mxu1 %v4909_v8  ;;  %v4959_v8 = vld [vmem:[%s6842_s8 + $0x124] ss:$28 sps:$4 sm:$0xff]  }
 0x1ce   :  { %2285 = vmatprep.subr.bf16.mxu1 %v4914_v9  ;;  %3487 = vmatpush1.bf16.msra.mxu0 %v4942_v20  ;;  %v4957_v9 = vld [vmem:[%s6842_s8 + $0x120] ss:$28 sps:$4 sm:$0xff]   ;;  %v4987_v20 = vld [vmem:[%s6842_s8 + $0x238] ss:$28 sps:$4 sm:$0xff]  }
 0x1cf   :  { %3488 = vmatprep.subr.bf16.mxu0 %v4950_v21  ;;  %v4995_v21 = vld [vmem:[%s6842_s8 + $0x274] ss:$28 sps:$4 sm:$0xff]  }
 0x1d2   :  { %3489 = vmatpush1.bf16.msra.mxu0 %v4948_v22  ;;  %v4993_v22 = vld [vmem:[%s6842_s8 + $0x270] ss:$28 sps:$4 sm:$0xff]  }
 0x1d3   :  { %3490 = vmatprep.subr.bf16.mxu0 %v4956_v23  ;;  %v5001_v23 = vld [vmem:[%s6842_s8 + $0x2ac] ss:$28 sps:$4 sm:$0xff]  }
 0x1d6   :  { %3491 = vmatpush1.bf16.msra.mxu0 %v4954_v24  ;;  %v4999_v24 = vld [vmem:[%s6842_s8 + $0x2a8] ss:$28 sps:$4 sm:$0xff]  }
 0x1d7   :  { %3492 = vmatprep.subr.bf16.mxu0 %v4962_v25  ;;  %v5007_v25 = vld [vmem:[%s6842_s8 + $0x2e4] ss:$28 sps:$4 sm:$0xff]  }
 0x1da   :  { %3493 = vmatpush1.bf16.msra.mxu0 %v4960_v26  ;;  %v5005_v26 = vld [vmem:[%s6842_s8 + $0x2e0] ss:$28 sps:$4 sm:$0xff]  }
 0x1db   :  { %3494 = vmatprep.subr.bf16.mxu0 %v4968_v27  ;;  %v5010_v27 = vld [vmem:[%s6842_s8 + $0x314] ss:$28 sps:$4 sm:$0xff]  }
 0x1de   :  { %3495 = vmatpush1.bf16.msra.mxu0 %v4966_v28  ;;  %v5013_v28 = vld [vmem:[%s6842_s8 + $0x31c] ss:$28 sps:$4 sm:$0xff]  }
 0x1df   :  { %3496 = vmatprep.subr.bf16.mxu0 %v4974_v29  ;;  %v5008_v29 = vld [vmem:[%s6842_s8 + $0x310] ss:$28 sps:$4 sm:$0xff]  }
 0x1e2   :  { %3497 = vmatpush1.bf16.msra.mxu0 %v4972_v30  ;;  %v5011_v30 = vld [vmem:[%s6842_s8 + $0x318] ss:$28 sps:$4 sm:$0xff]  }
 0x1e3   :  { %3498 = vmatprep.subr.bf16.mxu0 %v4980_v31  ;;  %v5016_v31 = vld [vmem:[%s6842_s8 + $0x34c] ss:$28 sps:$4 sm:$0xff]  }
 0x1e6   :  { %3499 = vmatpush1.bf16.msra.mxu0 %v4978_v32  ;;  %v5019_v32 = vld [vmem:[%s6842_s8 + $0x354] ss:$28 sps:$4 sm:$0xff]  }
 0x1e7   :  { %3500 = vmatprep.subr.bf16.mxu0 %v4986_v33  ;;  %v5014_v33 = vld [vmem:[%s6842_s8 + $0x348] ss:$28 sps:$4 sm:$0xff]  }
 0x1ea   :  { %3501 = vmatpush1.bf16.msra.mxu0 %v4984_v34  ;;  %v5017_v34 = vld [vmem:[%s6842_s8 + $0x350] ss:$28 sps:$4 sm:$0xff]  }
 0x1eb   :  { %3502 = vmatprep.subr.bf16.mxu0 %v4992_v35  ;;  %v5022_v35 = vld [vmem:[%s6842_s8 + $0x384] ss:$28 sps:$4 sm:$0xff]  }
 0x1ee   :  { %3503 = vmatpush1.bf16.msra.mxu0 %v4990_v36  ;;  %v5025_v36 = vld [vmem:[%s6842_s8 + $0x38c] ss:$28 sps:$4 sm:$0xff]  }
 0x1ef   :  { %3504 = vmatprep.subr.bf16.mxu0 %v4998_v37  ;;  %v2136_v37 = vld [vmem:[%s6841_s7] sm:$0xf] }
 0x1f2   :  { %3505 = vmatpush1.bf16.msra.mxu0 %v4996_v38  ;;  %v2141_v38 = vrot.slane %v2136_v37, %v6132_v3 }
 0x1f3   :  { %3506 = vmatprep.subr.bf16.mxu0 %v5004_v39  ;;  %v2145_v39 = vrot.slane %v2136_v37, %v6141_v6 }
 0x1f6   :  { %3507 = vmatpush1.bf16.msra.mxu0 %v5002_v40 }
 0x1f7   :  { %3508 = vmatprep.subr.bf16.mxu0 %v5010_v27 }
 0x1fa   :  { %3509 = vmatpush1.bf16.msra.mxu0 %v5008_v29  ;;  %v5047_v29 = vld [vmem:[%s6842_s8 + $0x468] ss:$28 sps:$4 sm:$0xff]  }
 0x1fb   :  { %3510 = vmatprep.subr.bf16.mxu0 %v5016_v31  ;;  %v5055_v31 = vld [vmem:[%s6842_s8 + $0x4a4] ss:$28 sps:$4 sm:$0xff]  }
 0x1fe   :  { %3511 = vmatpush1.bf16.msra.mxu0 %v5014_v33  ;;  %v5053_v33 = vld [vmem:[%s6842_s8 + $0x4a0] ss:$28 sps:$4 sm:$0xff]  }
 0x1ff   :  { %3523 = vmatprep.subr.bf16.mxu0 %v5022_v35  ;;  %v5061_v35 = vld [vmem:[%s6842_s8 + $0x4dc] ss:$28 sps:$4 sm:$0xff]  }
 0x293   :  { %v4437_v45 = vpop.f32.mrb[4].mxu0  ;;  %v2092_v46 = vpop.f32.mrb[4].mxu1 }
 0x294   :  { %v4438_v48 = vpop.f32.mrb[5].mxu0  ;;  %v2094_v49 = vpop.f32.mrb[5].mxu1 }
 0x295   :  { %v4439_v50 = vadd.f32 %v4438_v48, %v4437_v45  ;;  %v4440_v51 = vpop.f32.mrb[6].mxu0  ;;  %v2095_v52 = vpop.f32.mrb[6].mxu1  ;;  %v4912_v49 = vld [vmem:[%s6840_s6 + $0x8] ss:$16 sps:$4 sm:$0xff]  }
 0x296   :  { %v4441_v53 = vpop.f32.mrb[7].mxu0  ;;  %v2097_v54 = vpop.f32.mrb[7].mxu1 }
 0x297   :  { %v2052_v55 = vadd.f32 %v4439_v50, %v4183_v47  ;;  %v4442_v56 = vadd.f32 %v4441_v53, %v4440_v51  ;;  %v4917_v51 = vld [vmem:[%s6840_s6 + $0x2c] ss:$16 sps:$4 sm:$0xff]   ;;  %v4918_v54 = vld [vmem:[%s6840_s6 + $0x48] ss:$16 sps:$4 sm:$0xff]  }
 0x298   :  { %v4920_v53 = vld [vmem:[%s6840_s6 + $0x4c] ss:$16 sps:$4 sm:$0xff]  }
 0x299   :  { %v6167_v57 = vadd.f32 %v2092_v46, %v2052_v55  ;;  %v2055_v58 = vadd.f32 %v4442_v56, %v4183_v47  ;;  %v4923_v55 = vld [vmem:[%s6840_s6 + $0x6c] ss:$16 sps:$4 sm:$0xff]   ;;  %v4921_v56 = vld [vmem:[%s6840_s6 + $0x68] ss:$16 sps:$4 sm:$0xff]  }
 0x29b   :  { %v2099_v59 = vmul.f32 0.5, %v6167_v57  ;;  %3918 = vst [vmem:[#allocation4] sm:$0xff] %v6167_v57  ;;  %v6171_v60 = vadd.f32 %v2095_v52, %v2055_v58  ;;  %v4915_v52 = vld [vmem:[%s6840_s6 + $0x28] ss:$16 sps:$4 sm:$0xff]  }
 0x29c   :  { %v4927_v58 = vld [vmem:[%s6842_s8 + $0x8] ss:$28 sps:$4 sm:$0xff]  }
 0x29d   :  { %v2101_v62 = vmul.f32 1.442695, %v2099_v59  ;;  %v2100_v63 = vmul.f32 0.5, %v6171_v60  ;;  %3919 = vst [vmem:[#allocation4 + $0x8] sm:$0xff] %v6171_v60  ;;  %v4935_v59 = vld [vmem:[%s6842_s8 + $0x44] ss:$28 sps:$4 sm:$0xff]  }
 0x29f   :  { %5174 = vpow2.f32 %v2101_v62  ;;  %v2103_v1 = vmul.f32 1.442695, %v2100_v63  ;;  %v4939_v62 = vld [vmem:[%s6842_s8 + $0x78] ss:$28 sps:$4 sm:$0xff]  }
 0x2a0   :  { %v4947_v63 = vld [vmem:[%s6842_s8 + $0xb4] ss:$28 sps:$4 sm:$0xff]  }
 0x2a1   :  { %5176 = vpow2.f32 %v2103_v1  ;;  %v4953_v1 = vld [vmem:[%s6842_s8 + $0xec] ss:$28 sps:$4 sm:$0xff]  }
 0x2a9   :  { %v5175_v10 = vpop.eup %5174 }
 0x2aa   :  { %2109 = vrot.lane.b32.xlu0 %v5175_v10, %s5283_s2  ;;  %v4965_v10 = vld [vmem:[%s6842_s8 + $0x15c] ss:$28 sps:$4 sm:$0xff]  }
 0x2ab   :  { %v5177_v11 = vpop.eup %5176 }
 0x2ae   :  { %2111 = vrot.lane.b32.xlu0 %v5177_v11, %s5283_s2  ;;  %v4963_v11 = vld [vmem:[%s6842_s8 + $0x158] ss:$28 sps:$4 sm:$0xff]  }
 0x31c   :  { %v2110_v42 = vpop.permute.xlu0 %2109 }
 0x31d   :  { %v2115_v44 = vmul.f32 %v2110_v42, %v2105_v41 }
 0x31f   :  { %v2117_v47 = vadd.f32 %v2115_v44, %v6167_v57  ;;  %v4929_v57 = vld [vmem:[%s6842_s8 + $0xc] ss:$28 sps:$4 sm:$0xff]  }
 0x320   :  { %v2112_v45 = vpop.permute.xlu0 %2111 }
 0x321   :  { %v2116_v46 = vmul.f32 %v2112_v45, %v2106_v43 }
 0x323   :  { %v2118_v48 = vadd.f32 %v2116_v46, %v6171_v60  ;;  %v4933_v60 = vld [vmem:[%s6842_s8 + $0x40] ss:$28 sps:$4 sm:$0xff]  }
 0x325   :  { %v2119_v50 = vpack.c.bf16 %v2118_v48, %v2117_v47 }
 0x327   :  { %4226 = vmatmul.mubr.msk.bf16.vlgmr.msra.gmra.mrb[8].mxu1 %vm2238_vm1, %v2119_v50 }
 0x328   :  { %2286 = vmatpush1.bf16.msra.mxu1 %v4912_v49  ;;  %2317 = vmatprep.mubr.bf16.mxu1 %v5282_v18 }
 0x329   :  { %2287 = vmatprep.subr.bf16.mxu1 %v4917_v51 }
 0x32c   :  { %2288 = vmatpush1.bf16.msra.mxu1 %v4915_v52 }
 0x32d   :  { %2289 = vmatprep.subr.bf16.mxu1 %v4920_v53 }
 0x330   :  { %2290 = vmatpush1.bf16.msra.mxu1 %v4918_v54  ;;  %v5020_v54 = vld [vmem:[%s6842_s8 + $0x380] ss:$28 sps:$4 sm:$0xff]  }
 0x331   :  { %2291 = vmatprep.subr.bf16.mxu1 %v4923_v55  ;;  %v5023_v55 = vld [vmem:[%s6842_s8 + $0x388] ss:$28 sps:$4 sm:$0xff]  }
 0x334   :  { %2292 = vmatpush1.bf16.msra.mxu1 %v4921_v56  ;;  %v5028_v56 = vld [vmem:[%s6842_s8 + $0x3bc] ss:$28 sps:$4 sm:$0xff]  }
 0x335   :  { %3566 = vmatprep.subr.bf16.mxu1 %v4929_v57  ;;  %v5031_v57 = vld [vmem:[%s6842_s8 + $0x3c4] ss:$28 sps:$4 sm:$0xff]  }
 0x337   :  { %4227 = vmatmul.mubr.msk.bf16.vlgmr.msra.gmra.mrb[12].mxu1 %vm2238_vm1, %v2119_v50 }
 0x338   :  { %3567 = vmatpush1.bf16.msra.mxu1 %v4927_v58  ;;  %v5026_v58 = vld [vmem:[%s6842_s8 + $0x3b8] ss:$28 sps:$4 sm:$0xff]  }
 0x339   :  { %3568 = vmatprep.subr.bf16.mxu1 %v4935_v59  ;;  %v5029_v59 = vld [vmem:[%s6842_s8 + $0x3c0] ss:$28 sps:$4 sm:$0xff]  }
 0x33c   :  { %3569 = vmatpush1.bf16.msra.mxu1 %v4933_v60  ;;  %v2149_v60 = vrot.slane %v2136_v37, %v6135_v4 }
 0x33d   :  { %3570 = vmatprep.subr.bf16.mxu1 %v4941_v61  ;;  %v5034_v61 = vld [vmem:[%s6842_s8 + $0x3f4] ss:$28 sps:$4 sm:$0xff]  }
 0x340   :  { %3571 = vmatpush1.bf16.msra.mxu1 %v4939_v62  ;;  %v5037_v62 = vld [vmem:[%s6842_s8 + $0x3fc] ss:$28 sps:$4 sm:$0xff]  }
 0x341   :  { %3572 = vmatprep.subr.bf16.mxu1 %v4947_v63  ;;  %v2153_v63 = vrot.slane %v2136_v37, %v6144_v7  ;;  %v5059_v37 = vld [vmem:[%s6842_s8 + $0x4d8] ss:$28 sps:$4 sm:$0xff]  }
 0x344   :  { %3573 = vmatpush1.bf16.msra.mxu1 %v4945_v0 }
 0x345   :  { %3574 = vmatprep.subr.bf16.mxu1 %v4953_v1  ;;  %v5032_v1 = vld [vmem:[%s6842_s8 + $0x3f0] ss:$28 sps:$4 sm:$0xff]  }
 0x348   :  { %3575 = vmatpush1.bf16.msra.mxu1 %v4951_v5  ;;  %v5035_v5 = vld [vmem:[%s6842_s8 + $0x3f8] ss:$28 sps:$4 sm:$0xff]  }
 0x349   :  { %3576 = vmatprep.subr.bf16.mxu1 %v4959_v8 }
 0x34c   :  { %3577 = vmatpush1.bf16.msra.mxu1 %v4957_v9 }
 0x34d   :  { %3578 = vmatprep.subr.bf16.mxu1 %v4965_v10  ;;  %v5040_v10 = vld [vmem:[%s6842_s8 + $0x42c] ss:$28 sps:$4 sm:$0xff]  }
 0x350   :  { %3579 = vmatpush1.bf16.msra.mxu1 %v4963_v11  ;;  %v5043_v11 = vld [vmem:[%s6842_s8 + $0x434] ss:$28 sps:$4 sm:$0xff]  }
 0x351   :  { %3580 = vmatprep.subr.bf16.mxu1 %v4971_v12 }
 0x354   :  { %3581 = vmatpush1.bf16.msra.mxu1 %v4969_v13 }
 0x355   :  { %3582 = vmatprep.subr.bf16.mxu1 %v4977_v14 }
 0x358   :  { %3583 = vmatpush1.bf16.msra.mxu1 %v4975_v15 }
 0x359   :  { %3584 = vmatprep.subr.bf16.mxu1 %v4983_v16 }
 0x35c   :  { %3585 = vmatpush1.bf16.msra.mxu1 %v4981_v17  ;;  %v5038_v17 = vld [vmem:[%s6842_s8 + $0x428] ss:$28 sps:$4 sm:$0xff]  }
 0x35d   :  { %3586 = vmatprep.subr.bf16.mxu1 %v4989_v19  ;;  %v5041_v19 = vld [vmem:[%s6842_s8 + $0x430] ss:$28 sps:$4 sm:$0xff]  }
 0x360   :  { %3587 = vmatpush1.bf16.msra.mxu1 %v4987_v20 }
 0x361   :  { %3588 = vmatprep.subr.bf16.mxu1 %v4995_v21 }
 0x364   :  { %3589 = vmatpush1.bf16.msra.mxu1 %v4993_v22  ;;  %v5046_v22 = vld [vmem:[%s6842_s8 + $0x464] ss:$28 sps:$4 sm:$0xff]  }
 0x365   :  { %3590 = vmatprep.subr.bf16.mxu1 %v5001_v23  ;;  %v5049_v23 = vld [vmem:[%s6842_s8 + $0x46c] ss:$28 sps:$4 sm:$0xff]  }
 0x368   :  { %3591 = vmatpush1.bf16.msra.mxu1 %v4999_v24 }
 0x369   :  { %3592 = vmatprep.subr.bf16.mxu1 %v5007_v25 }
 0x36c   :  { %3593 = vmatpush1.bf16.msra.mxu1 %v5005_v26 }
 0x36d   :  { %3594 = vmatprep.subr.bf16.mxu1 %v5013_v28  ;;  %v5044_v28 = vld [vmem:[%s6842_s8 + $0x460] ss:$28 sps:$4 sm:$0xff]  }
 0x370   :  { %3595 = vmatpush1.bf16.msra.mxu1 %v5011_v30  ;;  %v5052_v30 = vld [vmem:[%s6842_s8 + $0x49c] ss:$28 sps:$4 sm:$0xff]  }
 0x371   :  { %3596 = vmatprep.subr.bf16.mxu1 %v5019_v32  ;;  %v5050_v32 = vld [vmem:[%s6842_s8 + $0x498] ss:$28 sps:$4 sm:$0xff]  }
 0x374   :  { %3597 = vmatpush1.bf16.msra.mxu1 %v5017_v34  ;;  %v5058_v34 = vld [vmem:[%s6842_s8 + $0x4d4] ss:$28 sps:$4 sm:$0xff]  }
 0x375   :  { %3609 = vmatprep.subr.bf16.mxu1 %v5025_v36  ;;  %v5056_v36 = vld [vmem:[%s6842_s8 + $0x4d0] ss:$28 sps:$4 sm:$0xff]  }
 0x3fa   :  { %v2276_v40 = vpop.f32.mrb[8].mxu1 }
 0x3fb   :  { %v2277_v41 = vadd.f32 %v2276_v40, %v2141_v38  ;;  %v2278_v42 = vpop.f32.mrb[9].mxu1  ;;  %v5062_v40 = vld [vmem:[%s6842_s8 + $0x508] ss:$28 sps:$4 sm:$0xff]  }
 0x3fc   :  { %v2279_v43 = vadd.f32 %v2278_v42, %v2145_v39  ;;  %v2280_v44 = vpop.f32.mrb[10].mxu1  ;;  %v5070_v42 = vld [vmem:[%s6842_s8 + $0x544] ss:$28 sps:$4 sm:$0xff]  }
 0x3fd   :  { %v2281_v45 = vadd.f32 %v2280_v44, %v2141_v38  ;;  %v2282_v46 = vpop.f32.mrb[11].mxu1  ;;  %v2328_v48 = vmax.f32 %v2277_v41, 0.0  ;;  %v5064_v38 = vld [vmem:[%s6842_s8 + $0x50c] ss:$28 sps:$4 sm:$0xff]   ;;  %v5068_v44 = vld [vmem:[%s6842_s8 + $0x540] ss:$28 sps:$4 sm:$0xff]  }
 0x3fe   :  { %v2283_v47 = vadd.f32 %v2282_v46, %v2145_v39  ;;  %v2329_v50 = vmax.f32 %v2279_v43, 0.0  ;;  %v5067_v39 = vld [vmem:[%s6842_s8 + $0x514] ss:$28 sps:$4 sm:$0xff]   ;;  %v5073_v43 = vld [vmem:[%s6842_s8 + $0x54c] ss:$28 sps:$4 sm:$0xff]  }
 0x3ff   :  { %v2332_v49 = vmax.f32 %v2281_v45, 0.0  ;;  %v5065_v41 = vld [vmem:[%s6842_s8 + $0x510] ss:$28 sps:$4 sm:$0xff]   ;;  %v5071_v45 = vld [vmem:[%s6842_s8 + $0x548] ss:$28 sps:$4 sm:$0xff]  }
 0x400   :  { %v2333_v51 = vmax.f32 %v2283_v47, 0.0  ;;  %v5076_v46 = vld [vmem:[%s6842_s8 + $0x14] ss:$28 sps:$4 sm:$0xff]  }
 0x401   :  { %v6425_v52 = vpack.c.bf16 %v2332_v49, %v2328_v48  ;;  %v5077_v47 = vld [vmem:[%s6842_s8 + $0x1d8] ss:$28 sps:$4 sm:$0xff]   ;;  %v5074_v48 = vld [vmem:[%s6842_s8 + $0x10] ss:$28 sps:$4 sm:$0xff]  }
 0x402   :  { %v6427_v53 = vpack.c.bf16 %v2333_v51, %v2329_v50  ;;  %v5078_v49 = vld [vmem:[%s6842_s8 + $0x18] ss:$28 sps:$4 sm:$0xff]   ;;  %v5081_v50 = vld [vmem:[%s6842_s8 + $0x4c] ss:$28 sps:$4 sm:$0xff]  }
 0x403   :  { %v5082_v51 = vld [vmem:[%s6842_s8 + $0x210] ss:$28 sps:$4 sm:$0xff]  }
 0x404   :  { %3512 = vmatprep.mubr.bf16.mxu0 %v6427_v53  ;;  %3598 = vmatprep.mubr.bf16.mxu1 %v6427_v53 }
 0x405   :  { %3513 = vmatmul.mubr.bf16.vlgmr.msra.gmra.mrb[8].mxu0 %v6425_v52  ;;  %3599 = vmatmul.mubr.bf16.vlgmr.msra.gmra.mrb[16].mxu1 %v6425_v52 }
 0x406   :  { %3524 = vmatpush1.bf16.msra.mxu0 %v5020_v54  ;;  %3610 = vmatpush1.bf16.msra.mxu1 %v5023_v55  ;;  %v5079_v54 = vld [vmem:[%s6842_s8 + $0x48] ss:$28 sps:$4 sm:$0xff]   ;;  %v5083_v55 = vld [vmem:[%s6842_s8 + $0x50] ss:$28 sps:$4 sm:$0xff]  }
 0x407   :  { %3525 = vmatprep.subr.bf16.mxu0 %v5028_v56  ;;  %3611 = vmatprep.subr.bf16.mxu1 %v5031_v57  ;;  %v5086_v56 = vld [vmem:[%s6842_s8 + $0x84] ss:$28 sps:$4 sm:$0xff]  }
 0x408   :  { %v5087_v57 = vld [vmem:[%s6842_s8 + $0x248] ss:$28 sps:$4 sm:$0xff]  }
 0x40a   :  { %v2319_v0 = vpop.f32.mrb[12].mxu1  ;;  %3526 = vmatpush1.bf16.msra.mxu0 %v5026_v58  ;;  %3612 = vmatpush1.bf16.msra.mxu1 %v5029_v59  ;;  %v5084_v58 = vld [vmem:[%s6842_s8 + $0x80] ss:$28 sps:$4 sm:$0xff]  }
 0x40b   :  { %v2320_v8 = vadd.f32 %v2319_v0, %v2149_v60  ;;  %v2321_v9 = vpop.f32.mrb[13].mxu1  ;;  %3527 = vmatprep.subr.bf16.mxu0 %v5034_v61  ;;  %3613 = vmatprep.subr.bf16.mxu1 %v5037_v62  ;;  %v5091_v59 = vld [vmem:[%s6842_s8 + $0xbc] ss:$28 sps:$4 sm:$0xff]  }
 0x40c   :  { %v2322_v12 = vadd.f32 %v2321_v9, %v2153_v63  ;;  %v2323_v13 = vpop.f32.mrb[14].mxu1  ;;  %v5089_v61 = vld [vmem:[%s6842_s8 + $0xb8] ss:$28 sps:$4 sm:$0xff]   ;;  %v5093_v62 = vld [vmem:[%s6842_s8 + $0xc0] ss:$28 sps:$4 sm:$0xff]  }
 0x40d   :  { %v2324_v14 = vadd.f32 %v2323_v13, %v2149_v60  ;;  %v2325_v15 = vpop.f32.mrb[15].mxu1  ;;  %v2330_v20 = vmax.f32 %v2320_v8, 0.0  ;;  %v5092_v60 = vld [vmem:[%s6842_s8 + $0x280] ss:$28 sps:$4 sm:$0xff]   ;;  %v5097_v0 = vld [vmem:[%s6842_s8 + $0x2b8] ss:$28 sps:$4 sm:$0xff]  }
 0x40e   :  { %v2326_v16 = vadd.f32 %v2325_v15, %v2153_v63  ;;  %3528 = vmatpush1.bf16.msra.mxu0 %v5032_v1  ;;  %3614 = vmatpush1.bf16.msra.mxu1 %v5035_v5  ;;  %v2331_v24 = vmax.f32 %v2322_v12, 0.0  ;;  %v5096_v63 = vld [vmem:[%s6842_s8 + $0xf4] ss:$28 sps:$4 sm:$0xff]   ;;  %v5101_v8 = vld [vmem:[%s6842_s8 + $0x12c] ss:$28 sps:$4 sm:$0xff]  }
 0x40f   :  { %v2334_v21 = vmax.f32 %v2324_v14, 0.0  ;;  %3529 = vmatprep.subr.bf16.mxu0 %v5040_v10  ;;  %3615 = vmatprep.subr.bf16.mxu1 %v5043_v11  ;;  %v5094_v1 = vld [vmem:[%s6842_s8 + $0xf0] ss:$28 sps:$4 sm:$0xff]   ;;  %v5098_v5 = vld [vmem:[%s6842_s8 + $0xf8] ss:$28 sps:$4 sm:$0xff]  }
 0x410   :  { %v2335_v25 = vmax.f32 %v2326_v16, 0.0  ;;  %v5102_v9 = vld [vmem:[%s6842_s8 + $0x2f0] ss:$28 sps:$4 sm:$0xff]   ;;  %v5099_v10 = vld [vmem:[%s6842_s8 + $0x128] ss:$28 sps:$4 sm:$0xff]  }
 0x411   :  { %v6483_v26 = vpack.c.bf16 %v2334_v21, %v2330_v20  ;;  %v5103_v11 = vld [vmem:[%s6842_s8 + $0x130] ss:$28 sps:$4 sm:$0xff]   ;;  %v5106_v12 = vld [vmem:[%s6842_s8 + $0x164] ss:$28 sps:$4 sm:$0xff]   ;;  %v5111_v16 = vld [vmem:[%s6842_s8 + $0x19c] ss:$28 sps:$4 sm:$0xff]  }
 0x412   :  { %v6485_v27 = vpack.c.bf16 %v2335_v25, %v2331_v24  ;;  %3530 = vmatpush1.bf16.msra.mxu0 %v5038_v17  ;;  %3616 = vmatpush1.bf16.msra.mxu1 %v5041_v19  ;;  %v5107_v13 = vld [vmem:[%s6842_s8 + $0x328] ss:$28 sps:$4 sm:$0xff]   ;;  %v5104_v14 = vld [vmem:[%s6842_s8 + $0x160] ss:$28 sps:$4 sm:$0xff]   ;;  %v5109_v19 = vld [vmem:[%s6842_s8 + $0x198] ss:$28 sps:$4 sm:$0xff]  }
 0x413   :  { %3531 = vmatprep.subr.bf16.mxu0 %v5046_v22  ;;  %3617 = vmatprep.subr.bf16.mxu1 %v5049_v23  ;;  %v5108_v15 = vld [vmem:[%s6842_s8 + $0x168] ss:$28 sps:$4 sm:$0xff]   ;;  %v5112_v17 = vld [vmem:[%s6842_s8 + $0x360] ss:$28 sps:$4 sm:$0xff]   ;;  %v5116_v21 = vld [vmem:[%s6842_s8 + $0x1d4] ss:$28 sps:$4 sm:$0xff]  }
 0x414   :  { %4403 = vmatprep.mubr.msk.bf16.mxu0 %vm2013_vm0, %v6485_v27  ;;  %4404 = vmatprep.mubr.msk.bf16.mxu1 %vm2013_vm0, %v6485_v27  ;;  %v5113_v20 = vld [vmem:[%s6842_s8 + $0x1a0] ss:$28 sps:$4 sm:$0xff]   ;;  %v5114_v22 = vld [vmem:[%s6842_s8 + $0x1d0] ss:$28 sps:$4 sm:$0xff]   ;;  %v5117_v23 = vld [vmem:[%s6842_s8 + $0x398] ss:$28 sps:$4 sm:$0xff]  }
 0x415   :  { %v5120_v24 = vld [vmem:[%s6842_s8 + $0x20c] ss:$28 sps:$4 sm:$0xff]  }
 0x416   :  { %3532 = vmatpush1.bf16.msra.mxu0 %v5044_v28  ;;  %3618 = vmatpush1.bf16.msra.mxu1 %v5047_v29  ;;  %v5118_v25 = vld [vmem:[%s6842_s8 + $0x208] ss:$28 sps:$4 sm:$0xff]   ;;  %v5121_v28 = vld [vmem:[%s6842_s8 + $0x3d0] ss:$28 sps:$4 sm:$0xff]  }
 0x417   :  { %3533 = vmatprep.subr.bf16.mxu0 %v5052_v30  ;;  %3619 = vmatprep.subr.bf16.mxu1 %v5055_v31  ;;  %v5124_v29 = vld [vmem:[%s6842_s8 + $0x244] ss:$28 sps:$4 sm:$0xff]  }
 0x418   :  { %v5122_v30 = vld [vmem:[%s6842_s8 + $0x240] ss:$28 sps:$4 sm:$0xff]   ;;  %v5125_v31 = vld [vmem:[%s6842_s8 + $0x408] ss:$28 sps:$4 sm:$0xff]  }
 0x41a   :  { %3534 = vmatpush1.bf16.msra.mxu0 %v5050_v32  ;;  %3620 = vmatpush1.bf16.msra.mxu1 %v5053_v33  ;;  %v5128_v32 = vld [vmem:[%s6842_s8 + $0x27c] ss:$28 sps:$4 sm:$0xff]  }
 0x41b   :  { %3535 = vmatprep.subr.bf16.mxu0 %v5058_v34  ;;  %3621 = vmatprep.subr.bf16.mxu1 %v5061_v35  ;;  %v5126_v33 = vld [vmem:[%s6842_s8 + $0x278] ss:$28 sps:$4 sm:$0xff]   ;;  %v5129_v34 = vld [vmem:[%s6842_s8 + $0x440] ss:$28 sps:$4 sm:$0xff]  }
 0x41c   :  { %v5132_v35 = vld [vmem:[%s6842_s8 + $0x2b4] ss:$28 sps:$4 sm:$0xff]  }
 0x41e   :  { %3536 = vmatpush1.bf16.msra.mxu0 %v5056_v36  ;;  %3622 = vmatpush1.bf16.msra.mxu1 %v5059_v37  ;;  %v5130_v36 = vld [vmem:[%s6842_s8 + $0x2b0] ss:$28 sps:$4 sm:$0xff]   ;;  %v5133_v37 = vld [vmem:[%s6842_s8 + $0x478] ss:$28 sps:$4 sm:$0xff]  }
 0x41f   :  { %3537 = vmatprep.subr.bf16.mxu0 %v5064_v38  ;;  %3623 = vmatprep.subr.bf16.mxu1 %v5067_v39  ;;  %v5136_v38 = vld [vmem:[%s6842_s8 + $0x2ec] ss:$28 sps:$4 sm:$0xff]  }
 0x420   :  { %v5134_v39 = vld [vmem:[%s6842_s8 + $0x2e8] ss:$28 sps:$4 sm:$0xff]  }
 0x422   :  { %3538 = vmatpush1.bf16.msra.mxu0 %v5062_v40  ;;  %3624 = vmatpush1.bf16.msra.mxu1 %v5065_v41  ;;  %v5137_v40 = vld [vmem:[%s6842_s8 + $0x4b0] ss:$28 sps:$4 sm:$0xff]   ;;  %v5140_v41 = vld [vmem:[%s6842_s8 + $0x324] ss:$28 sps:$4 sm:$0xff]  }
 0x423   :  { %3539 = vmatprep.subr.bf16.mxu0 %v5070_v42  ;;  %3625 = vmatprep.subr.bf16.mxu1 %v5073_v43  ;;  %v5138_v42 = vld [vmem:[%s6842_s8 + $0x320] ss:$28 sps:$4 sm:$0xff]   ;;  %v5141_v43 = vld [vmem:[%s6842_s8 + $0x4e8] ss:$28 sps:$4 sm:$0xff]  }
 0x426   :  { %3540 = vmatpush1.bf16.msra.mxu0 %v5068_v44  ;;  %3626 = vmatpush1.bf16.msra.mxu1 %v5071_v45  ;;  %v5144_v44 = vld [vmem:[%s6842_s8 + $0x35c] ss:$28 sps:$4 sm:$0xff]  }
 0x427   :  { %3652 = vmatprep.subr.bf16.mxu0 %v5076_v46  ;;  %4443 = vmatprep.subr.bf16.mxu1 %v5077_v47  ;;  %v5142_v45 = vld [vmem:[%s6842_s8 + $0x358] ss:$28 sps:$4 sm:$0xff]   ;;  %v5145_v46 = vld [vmem:[%s6842_s8 + $0x520] ss:$28 sps:$4 sm:$0xff]  }
 0x428   :  { %v5148_v47 = vld [vmem:[%s6842_s8 + $0x394] ss:$28 sps:$4 sm:$0xff]  }
 0x429   :  { %3556 = vmatmul.mubr.bf16.vlgmr.msra.gmra.mrb[8].mxu0 %v6483_v26  ;;  %3642 = vmatmul.mubr.bf16.vlgmr.msra.gmra.mrb[16].mxu1 %v6483_v26 }
 0x42a   :  { %3653 = vmatpush1.bf16.msra.mxu0 %v5074_v48  ;;  %3684 = vmatprep.mubr.bf16.mxu0 %v6427_v53  ;;  %v5146_v48 = vld [vmem:[%s6842_s8 + $0x390] ss:$28 sps:$4 sm:$0xff]  }
 0x42b   :  { %4444 = vmatpush3.bf16.msra.mxu1 %v5078_v49  ;;  %3770 = vmatprep.mubr.bf16.mxu1 %v6427_v53  ;;  %v5088_v53 = vld [vmem:[%s6842_s8 + $0x88] ss:$28 sps:$4 sm:$0xff]   ;;  %v5149_v49 = vld [vmem:[%s6842_s8 + $0x558] ss:$28 sps:$4 sm:$0xff]  }
 0x42c   :  { %3654 = vmatprep.subr.bf16.mxu0 %v5081_v50  ;;  %4445 = vmatprep.subr.bf16.mxu1 %v5082_v51  ;;  %v5152_v50 = vld [vmem:[%s6842_s8 + $0x3cc] ss:$28 sps:$4 sm:$0xff]  }
 0x42d   :  { %v5150_v51 = vld [vmem:[%s6842_s8 + $0x3c8] ss:$28 sps:$4 sm:$0xff]  }
 0x42e   :  { %3655 = vmatpush1.bf16.msra.mxu0 %v5079_v54  ;;  %v5155_v54 = vld [vmem:[%s6842_s8 + $0x404] ss:$28 sps:$4 sm:$0xff]  }
 0x42f   :  { %4446 = vmatpush3.bf16.msra.mxu1 %v5083_v55  ;;  %3656 = vmatprep.subr.bf16.mxu0 %v5086_v56  ;;  %v5161_v55 = vld [vmem:[%s6842_s8 + $0x474] ss:$28 sps:$4 sm:$0xff]  }
 0x430   :  { %4447 = vmatprep.subr.bf16.mxu1 %v5087_v57  ;;  %v5159_v56 = vld [vmem:[%s6842_s8 + $0x470] ss:$28 sps:$4 sm:$0xff]  }
 0x431   :  { %v5164_v57 = vld [vmem:[%s6842_s8 + $0x4ac] ss:$28 sps:$4 sm:$0xff]  }
 0x432   :  { %3657 = vmatpush1.bf16.msra.mxu0 %v5084_v58  ;;  %v5162_v58 = vld [vmem:[%s6842_s8 + $0x4a8] ss:$28 sps:$4 sm:$0xff]  }
 0x433   :  { %4448 = vmatpush3.bf16.msra.mxu1 %v5088_v53  ;;  %3658 = vmatprep.subr.bf16.mxu0 %v5091_v59  ;;  %v5167_v53 = vld [vmem:[%s6842_s8 + $0x4e4] ss:$28 sps:$4 sm:$0xff]  }
 0x434   :  { %4449 = vmatprep.subr.bf16.mxu1 %v5092_v60  ;;  %v5165_v59 = vld [vmem:[%s6842_s8 + $0x4e0] ss:$28 sps:$4 sm:$0xff]  }
 0x435   :  { %v5170_v60 = vld [vmem:[%s6842_s8 + $0x51c] ss:$28 sps:$4 sm:$0xff]  }
 0x436   :  { %3659 = vmatpush1.bf16.msra.mxu0 %v5089_v61  ;;  %v5168_v61 = vld [vmem:[%s6842_s8 + $0x518] ss:$28 sps:$4 sm:$0xff]  }
 0x437   :  { %4450 = vmatpush3.bf16.msra.mxu1 %v5093_v62  ;;  %3660 = vmatprep.subr.bf16.mxu0 %v5096_v63  ;;  %v5173_v62 = vld [vmem:[%s6842_s8 + $0x554] ss:$28 sps:$4 sm:$0xff]  }
 0x438   :  { %4451 = vmatprep.subr.bf16.mxu1 %v5097_v0  ;;  %v5171_v63 = vld [vmem:[%s6842_s8 + $0x550] ss:$28 sps:$4 sm:$0xff]   ;;  %v6794_v0 = vld [vmem:[%s6843_s9] sm:$0xff] }
 0x43a   :  { %3661 = vmatpush1.bf16.msra.mxu0 %v5094_v1  ;;  %v2545_v1 = vrot.slane %v6794_v0, %v6132_v3 }
 0x43b   :  { %4452 = vmatpush3.bf16.msra.mxu1 %v5098_v5  ;;  %3662 = vmatprep.subr.bf16.mxu0 %v5101_v8  ;;  %v2553_v5 = vrot.slane %v6794_v0, %v6135_v4  ;;  %v2549_v8 = vrot.slane %v6794_v0, %v6141_v6 }
 0x43c   :  { %4453 = vmatprep.subr.bf16.mxu1 %v5102_v9  ;;  %v2557_v9 = vrot.slane %v6794_v0, %v6144_v7 }
 0x43e   :  { %3663 = vmatpush1.bf16.msra.mxu0 %v5099_v10 }
 0x43f   :  { %4454 = vmatpush3.bf16.msra.mxu1 %v5103_v11  ;;  %3664 = vmatprep.subr.bf16.mxu0 %v5106_v12 }
 0x440   :  { %4455 = vmatprep.subr.bf16.mxu1 %v5107_v13 }
 0x442   :  { %3665 = vmatpush1.bf16.msra.mxu0 %v5104_v14 }
 0x443   :  { %4456 = vmatpush3.bf16.msra.mxu1 %v5108_v15  ;;  %3666 = vmatprep.subr.bf16.mxu0 %v5111_v16 }
 0x444   :  { %4457 = vmatprep.subr.bf16.mxu1 %v5112_v17 }
 0x446   :  { %3667 = vmatpush1.bf16.msra.mxu0 %v5109_v19 }
 0x447   :  { %4458 = vmatpush3.bf16.msra.mxu1 %v5113_v20  ;;  %3668 = vmatprep.subr.bf16.mxu0 %v5116_v21 }
 0x448   :  { %3779 = vmatprep.subr.bf16.mxu1 %v5282_v18 }
 0x44a   :  { %3771 = vmatmul.mubr.bf16.vlgmr.msra.gmra.mrb[20].mxu1 %v6425_v52  ;;  %3669 = vmatpush1.bf16.msra.mxu0 %v5114_v22 }
 0x44b   :  { %3780 = vmatpush1.bf16.msra.mxu1 %v5117_v23  ;;  %4406 = vmatprep.mubr.msk.bf16.mxu1 %vm2013_vm0, %v6485_v27 }
 0x44c   :  { %3670 = vmatprep.subr.bf16.mxu0 %v5120_v24  ;;  %3781 = vmatprep.subr.bf16.mxu1 %v5282_v18 }
 0x44e   :  { %3671 = vmatpush1.bf16.msra.mxu0 %v5118_v25 }
 0x44f   :  { %3782 = vmatpush1.bf16.msra.mxu1 %v5121_v28  ;;  %3672 = vmatprep.subr.bf16.mxu0 %v5124_v29 }
 0x450   :  { %3783 = vmatprep.subr.bf16.mxu1 %v5282_v18 }
 0x452   :  { %3673 = vmatpush1.bf16.msra.mxu0 %v5122_v30 }
 0x453   :  { %3784 = vmatpush1.bf16.msra.mxu1 %v5125_v31  ;;  %3674 = vmatprep.subr.bf16.mxu0 %v5128_v32 }
 0x454   :  { %3785 = vmatprep.subr.bf16.mxu1 %v5282_v18 }
 0x456   :  { %3675 = vmatpush1.bf16.msra.mxu0 %v5126_v33 }
 0x457   :  { %3786 = vmatpush1.bf16.msra.mxu1 %v5129_v34  ;;  %3676 = vmatprep.subr.bf16.mxu0 %v5132_v35 }
 0x458   :  { %3787 = vmatprep.subr.bf16.mxu1 %v5282_v18 }
 0x45a   :  { %3677 = vmatpush1.bf16.msra.mxu0 %v5130_v36 }
 0x45b   :  { %3788 = vmatpush1.bf16.msra.mxu1 %v5133_v37  ;;  %3678 = vmatprep.subr.bf16.mxu0 %v5136_v38 }
 0x45c   :  { %3789 = vmatprep.subr.bf16.mxu1 %v5282_v18 }
 0x45e   :  { %3679 = vmatpush1.bf16.msra.mxu0 %v5134_v39 }
 0x45f   :  { %3790 = vmatpush1.bf16.msra.mxu1 %v5137_v40  ;;  %3680 = vmatprep.subr.bf16.mxu0 %v5140_v41 }
 0x460   :  { %3791 = vmatprep.subr.bf16.mxu1 %v5282_v18 }
 0x462   :  { %3681 = vmatpush1.bf16.msra.mxu0 %v5138_v42 }
 0x463   :  { %3792 = vmatpush1.bf16.msra.mxu1 %v5141_v43  ;;  %3682 = vmatprep.subr.bf16.mxu0 %v5144_v44 }
 0x464   :  { %3793 = vmatprep.subr.bf16.mxu1 %v5282_v18 }
 0x466   :  { %3683 = vmatpush1.bf16.msra.mxu0 %v5142_v45 }
 0x467   :  { %3794 = vmatpush1.bf16.msra.mxu1 %v5145_v46  ;;  %3695 = vmatprep.subr.bf16.mxu0 %v5148_v47 }
 0x468   :  { %3795 = vmatprep.subr.bf16.mxu1 %v5282_v18  ;;  %v5153_v18 = vld [vmem:[%s6842_s8 + $0x400] ss:$28 sps:$4 sm:$0xff]  }
 0x469   :  { %3685 = vmatmul.mubr.bf16.vlgmr.msra.gmra.mrb[12].mxu0 %v6425_v52  ;;  %v5158_v52 = vld [vmem:[%s6842_s8 + $0x43c] ss:$28 sps:$4 sm:$0xff]  }
 0x46a   :  { %3696 = vmatpush1.bf16.msra.mxu0 %v5146_v48  ;;  %4405 = vmatprep.mubr.msk.bf16.mxu0 %vm2013_vm0, %v6485_v27  ;;  %v5156_v27 = vld [vmem:[%s6842_s8 + $0x438] ss:$28 sps:$4 sm:$0xff]   ;;  %s5284_s8 = smov [#allocation4]  }
 0x46b   :  { %3796 = vmatpush1.bf16.msra.mxu1 %v5149_v49  ;;  %3697 = vmatprep.subr.bf16.mxu0 %v5152_v50  ;;  %s3937_s9 = sshll.u32 %s5284_s8, 4  ;;  %s3938_s9 = int_to_ptr.vmem [resolvable:$true] %s3937_s9 }
 0x46c   :  { %s5234_s4 = scalar_lea.vmem %s3938_s9, 256  ;;  %p5239_p1 = scmp.lt.s32.totalorder %s3938_s9, %s3938_s9 }
 0x46d   :  { %p5235_p0 = scmp.ne.s32.totalorder %s3938_s9, %s5234_s4  ;;  %p5240_p2 = scmp.lt.s32.totalorder %s5234_s4, %s5234_s4 }
 0x46e   :  { %3812 = vmatmul.mubr.bf16.vlgmr.msra.gmra.mrb[24].mxu1 %v6483_v26  ;;  %3698 = vmatpush1.bf16.msra.mxu0 %v5150_v51 }
 0x46f   :  { %3699 = vmatprep.subr.bf16.mxu0 %v5155_v54  ;;  %p5241_p3 = por %p5240_p2, %p5239_p1 }
 0x471   :  { %p5242_p4 = pnand %p5241_p3, %p5235_p0 }
 0x472   :  { %3700 = vmatpush1.bf16.msra.mxu0 %v5153_v18 }
 0x473   :  { %3701 = vmatprep.subr.bf16.mxu0 %v5158_v52 }
 0x476   :  { %3702 = vmatpush1.bf16.msra.mxu0 %v5156_v27 }
 0x477   :  { %3703 = vmatprep.subr.bf16.mxu0 %v5161_v55 }
 0x47a   :  { %3704 = vmatpush1.bf16.msra.mxu0 %v5159_v56 }
 0x47b   :  { %3705 = vmatprep.subr.bf16.mxu0 %v5164_v57 }
 0x47e   :  { %3706 = vmatpush1.bf16.msra.mxu0 %v5162_v58 }
 0x47f   :  { %3707 = vmatprep.subr.bf16.mxu0 %v5167_v53 }
 0x482   :  { %3708 = vmatpush1.bf16.msra.mxu0 %v5165_v59 }
 0x483   :  { %3709 = vmatprep.subr.bf16.mxu0 %v5170_v60 }
 0x486   :  { %3710 = vmatpush1.bf16.msra.mxu0 %v5168_v61 }
 0x487   :  { %3711 = vmatprep.subr.bf16.mxu0 %v5173_v62 }
 0x48a   :  { %3712 = vmatpush1.bf16.msra.mxu0 %v5171_v63 }
 0x48d   :  { %3728 = vmatmul.mubr.bf16.vlgmr.msra.gmra.mrb[12].mxu0 %v6483_v26 }
 0x4fc   :  { %v3557_v10 = vpop.f32.mrb[8].mxu0  ;;  %v3643_v11 = vpop.f32.mrb[16].mxu1 }
 0x4fd   :  { %v4473_v26 = vadd.f32 %v3557_v10, %v2545_v1  ;;  %v4477_v12 = vadd.f32 %v3643_v11, %v2553_v5  ;;  %v3559_v13 = vpop.f32.mrb[9].mxu0  ;;  %v3645_v14 = vpop.f32.mrb[17].mxu1 }
 0x4fe   :  { %v4474_v15 = vadd.f32 %v3559_v13, %v2549_v8  ;;  %v4478_v16 = vadd.f32 %v3645_v14, %v2557_v9  ;;  %v3561_v17 = vpop.f32.mrb[10].mxu0  ;;  %v3647_v19 = vpop.f32.mrb[18].mxu1 }
 0x4ff   :  { %v4407_v3 = vmul.f32 -1.442695, %v4473_v26  ;;  %v4409_v20 = vmul.f32 -1.442695, %v4477_v12  ;;  %v4475_v21 = vadd.f32 %v3561_v17, %v2545_v1  ;;  %v4479_v4 = vadd.f32 %v3647_v19, %v2553_v5  ;;  %v3563_v22 = vpop.f32.mrb[11].mxu0  ;;  %v3649_v23 = vpop.f32.mrb[19].mxu1 }
 0x500   :  { %v4408_v6 = vmul.f32 -1.442695, %v4474_v15  ;;  %v4410_v24 = vmul.f32 -1.442695, %v4478_v16  ;;  %v4476_v25 = vadd.f32 %v3563_v22, %v2549_v8  ;;  %v4480_v7 = vadd.f32 %v3649_v23, %v2557_v9 }
 0x501   :  { %5178 = vpow2.f32 %v4407_v3  ;;  %v4414_v28 = vmul.f32 -1.442695, %v4475_v21  ;;  %v4416_v29 = vmul.f32 -1.442695, %v4479_v4 }
 0x502   :  { %5180 = vpow2.f32 %v4409_v20  ;;  %v4415_v30 = vmul.f32 -1.442695, %v4476_v25  ;;  %v4417_v31 = vmul.f32 -1.442695, %v4480_v7 }
 0x503   :  { %5182 = vpow2.f32 %v4408_v6 }
 0x504   :  { %5184 = vpow2.f32 %v4410_v24 }
 0x505   :  { %5186 = vpow2.f32 %v4414_v28 }
 0x506   :  { %5245 = shalt.err (!%p5242_p4)
}
 0x507   :  { %s5246_s14 = scalar_lea.hbm %s6845_s11, 256 }
 0x508   :  { %p5247_p5 = scmp.ne.s32.totalorder %s6845_s11, %s5246_s14  ;;  %p5250_p6 = scmp.lt.u32.totalorder %s5246_s14, %s6845_s11 }
 0x50a   :  { %p5252_p7 = pnand %p5250_p6, %p5247_p5 }
 0x50c   :  { %5255 = shalt.err (!%p5252_p7)
}
 0x50d   :  { %s5285_s18 = smov 128   ;;  %s5286_s19 = smov 8   ;;  %5188 = vpow2.f32 %v4416_v29  ;;  %v5179_v32 = vpop.eup %5178  ;;  %v2568_v60 = vsub.s32 6, %v6129_v2  ;;  %v2560_v17 = vsub.s32 4, %v6129_v2  ;;  %v2564_v19 = vsub.s32 5, %v6129_v2 }
 0x50e   :  { %3943 = dma.vmem_to_hbm [thread:$0]  %s3938_s9, 256, %s6845_s11, [#allocation5], %s5285_s18, %s5285_s18, %s5286_s19   ;;  %5190 = vpow2.f32 %v4415_v30  ;;  %v5181_v33 = vpop.eup %5180  ;;  %v3862_v34 = vadd.f32 1.0, %v5179_v32 }
 0x50f   :  { %5192 = vpow2.f32 %v4417_v31  ;;  %v5183_v35 = vpop.eup %5182  ;;  %v3864_v36 = vadd.f32 1.0, %v5181_v33  ;;  %v2569_v61 = vrot.slane %v6794_v0, %v2568_v60  ;;  %v2561_v20 = vrot.slane %v6794_v0, %v2560_v17  ;;  %s5287_s11 = smov [#allocation2]  }
 0x510   :  { %v5185_v37 = vpop.eup %5184  ;;  %5194 = vrcp.f32 %v3862_v34  ;;  %v3863_v38 = vadd.f32 1.0, %v5183_v35  ;;  %v2565_v21 = vrot.slane %v6794_v0, %v2564_v19  ;;  %s3925_s21 = sshll.u32 %s5287_s11, 4  ;;  %s3926_s21 = int_to_ptr.vmem [resolvable:$true] %s3925_s21 }
 0x511   :  { %v5187_v39 = vpop.eup %5186  ;;  %5196 = vrcp.f32 %v3864_v36  ;;  %v3865_v40 = vadd.f32 1.0, %v5185_v37  ;;  %s5256_s1 = scalar_lea.vmem %s3926_s21, 1792  ;;  %p5261_p9 = scmp.lt.s32.totalorder %s3926_s21, %s3926_s21 }
 0x512   :  { %5198 = vrcp.f32 %v3863_v38  ;;  %v3869_v42 = vadd.f32 1.0, %v5187_v39  ;;  %p5257_p8 = scmp.ne.s32.totalorder %s3926_s21, %s5256_s1  ;;  %p5262_p10 = scmp.lt.s32.totalorder %s5256_s1, %s5256_s1 }
 0x513   :  { %5200 = vrcp.f32 %v3865_v40 }
 0x514   :  { %5202 = vrcp.f32 %v3869_v42  ;;  %p5263_p11 = por %p5262_p10, %p5261_p9 }
 0x516   :  { %p5264_p12 = pnand %p5263_p11, %p5257_p8 }
 0x517   :  { %v5189_v41 = vpop.eup %5188 }
 0x518   :  { %v5191_v43 = vpop.eup %5190  ;;  %v3871_v44 = vadd.f32 1.0, %v5189_v41 }
 0x519   :  { %v5193_v45 = vpop.eup %5192  ;;  %v3870_v46 = vadd.f32 1.0, %v5191_v43 }
 0x51a   :  { %5204 = vrcp.f32 %v3871_v44  ;;  %v3872_v47 = vadd.f32 1.0, %v5193_v45  ;;  %v5195_v48 = vpop.eup %5194 }
 0x51b   :  { %5206 = vrcp.f32 %v3870_v46  ;;  %v5197_v49 = vpop.eup %5196  ;;  %3904 = vst [vmem:[#allocation2] sm:$0xff] %v5195_v48 }
 0x51c   :  { %5208 = vrcp.f32 %v3872_v47  ;;  %v5199_v50 = vpop.eup %5198  ;;  %3906 = vst [vmem:[#allocation2 + $0x10] sm:$0xff] %v5197_v49 }
 0x51d   :  { %v5201_v51 = vpop.eup %5200  ;;  %3905 = vst [vmem:[#allocation2 + $0x8] sm:$0xff] %v5199_v50  ;;  %v4459_v52 = vpop.f32.mrb[20].mxu1 }
 0x51e   :  { %v5203_v54 = vpop.eup %5202  ;;  %3907 = vst [vmem:[#allocation2 + $0x18] sm:$0xff] %v5201_v51  ;;  %v4460_v55 = vpop.f32.mrb[21].mxu1 }
 0x51f   :  { %3911 = vst [vmem:[#allocation2 + $0x38] sm:$0xff] %v5203_v54  ;;  %v4461_v57 = vadd.f32 %v4460_v55, %v4459_v52  ;;  %v4462_v58 = vpop.f32.mrb[22].mxu1 }
 0x520   :  { %v4463_v53 = vpop.f32.mrb[23].mxu1 }
 0x521   :  { %v4464_v59 = vadd.f32 %v4463_v53, %v4462_v58  ;;  %v3773_v62 = vadd.f32 %v4461_v57, %v2569_v61 }
 0x523   :  { %v3776_v8 = vadd.f32 %v4464_v59, %v2569_v61 }
 0x524   :  { %v5205_v18 = vpop.eup %5204 }
 0x525   :  { %v5207_v27 = vpop.eup %5206  ;;  %3913 = vst [vmem:[#allocation2 + $0x48] sm:$0xff] %v5205_v18 }
 0x526   :  { %v5209_v56 = vpop.eup %5208  ;;  %3912 = vst [vmem:[#allocation2 + $0x40] sm:$0xff] %v5207_v27 }
 0x527   :  { %3914 = vst [vmem:[#allocation2 + $0x50] sm:$0xff] %v5209_v56 }
 0x541   :  { %v3813_v63 = vpop.f32.mrb[24].mxu1 }
 0x542   :  { %v3814_v1 = vadd.f32 %v3813_v63, %v3773_v62  ;;  %v3815_v5 = vpop.f32.mrb[25].mxu1 }
 0x543   :  { %v3816_v9 = vpop.f32.mrb[26].mxu1 }
 0x544   :  { %v4413_v10 = vmul.f32 -1.442695, %v3814_v1  ;;  %v3817_v11 = vadd.f32 %v3816_v9, %v3776_v8  ;;  %v3818_v26 = vpop.f32.mrb[27].mxu1 }
 0x546   :  { %5210 = vpow2.f32 %v4413_v10  ;;  %v4420_v12 = vmul.f32 -1.442695, %v3817_v11 }
 0x548   :  { %5212 = vpow2.f32 %v4420_v12 }
 0x550   :  { %v5211_v13 = vpop.eup %5210 }
 0x551   :  { %v3868_v14 = vadd.f32 1.0, %v5211_v13 }
 0x552   :  { %v5213_v15 = vpop.eup %5212 }
 0x553   :  { %5214 = vrcp.f32 %v3868_v14  ;;  %v3875_v16 = vadd.f32 1.0, %v5213_v15 }
 0x555   :  { %5216 = vrcp.f32 %v3875_v16 }
 0x55d   :  { %v5215_v3 = vpop.eup %5214 }
 0x55e   :  { %3910 = vst [vmem:[#allocation2 + $0x30] sm:$0xff] %v5215_v3 }
 0x55f   :  { %v5217_v4 = vpop.eup %5216 }
 0x560   :  { %3917 = vst [vmem:[#allocation2 + $0x68] sm:$0xff] %v5217_v4  ;;  %v3729_v22 = vpop.f32.mrb[12].mxu0 }
 0x561   :  { %v4481_v23 = vadd.f32 %v3729_v22, %v2561_v20  ;;  %v3731_v6 = vpop.f32.mrb[13].mxu0 }
 0x562   :  { %v4482_v24 = vadd.f32 %v3731_v6, %v2565_v21  ;;  %v3733_v25 = vpop.f32.mrb[14].mxu0 }
 0x563   :  { %v4411_v7 = vmul.f32 -1.442695, %v4481_v23  ;;  %v4483_v28 = vadd.f32 %v3733_v25, %v2561_v20  ;;  %v3735_v29 = vpop.f32.mrb[15].mxu0 }
 0x564   :  { %v4412_v30 = vmul.f32 -1.442695, %v4482_v24  ;;  %v4484_v31 = vadd.f32 %v3735_v29, %v2565_v21 }
 0x565   :  { %5218 = vpow2.f32 %v4411_v7  ;;  %v4418_v2 = vmul.f32 -1.442695, %v4483_v28 }
 0x566   :  { %5220 = vpow2.f32 %v4412_v30  ;;  %v4419_v32 = vmul.f32 -1.442695, %v4484_v31 }
 0x567   :  { %5222 = vpow2.f32 %v4418_v2 }
 0x568   :  { %5224 = vpow2.f32 %v4419_v32 }
 0x56f   :  { %v5219_v33 = vpop.eup %5218 }
 0x570   :  { %v5221_v0 = vpop.eup %5220  ;;  %v3866_v34 = vadd.f32 1.0, %v5219_v33 }
 0x571   :  { %v5223_v35 = vpop.eup %5222  ;;  %v3867_v36 = vadd.f32 1.0, %v5221_v0 }
 0x572   :  { %v5225_v37 = vpop.eup %5224  ;;  %5226 = vrcp.f32 %v3866_v34  ;;  %v3873_v38 = vadd.f32 1.0, %v5223_v35 }
 0x573   :  { %5228 = vrcp.f32 %v3867_v36  ;;  %v3874_v39 = vadd.f32 1.0, %v5225_v37 }
 0x574   :  { %5230 = vrcp.f32 %v3873_v38 }
 0x575   :  { %5232 = vrcp.f32 %v3874_v39 }
 0x57c   :  { %v5227_v40 = vpop.eup %5226 }
 0x57d   :  { %v5229_v41 = vpop.eup %5228  ;;  %3908 = vst [vmem:[#allocation2 + $0x20] sm:$0xff] %v5227_v40 }
 0x57e   :  { %v5231_v42 = vpop.eup %5230  ;;  %3909 = vst [vmem:[#allocation2 + $0x28] sm:$0xff] %v5229_v41 }
 0x57f   :  { %v5233_v43 = vpop.eup %5232  ;;  %3915 = vst [vmem:[#allocation2 + $0x58] sm:$0xff] %v5231_v42 }
 0x580   :  { %3916 = vst [vmem:[#allocation2 + $0x60] sm:$0xff] %v5233_v43 }
 0x581   :  { %5267 = shalt.err (!%p5264_p12)
}
 0x582   :  { %s5268_s24 = scalar_lea.hbm %s6844_s10, 1792 }
 0x583   :  { %p5269_p13 = scmp.ne.s32.totalorder %s6844_s10, %s5268_s24  ;;  %p5272_p0 = scmp.lt.u32.totalorder %s5268_s24, %s6844_s10 }
 0x585   :  { %p5274_p1 = pnand %p5272_p0, %p5269_p13 }
 0x587   :  { %5277 = shalt.err (!%p5274_p1)
}
 0x588   :  { %s5288_s2 = smov 896   ;;  %s5289_s29 = smov 56  }
 0x589   :  { %3931 = dma.vmem_to_hbm [thread:$0]  %s3926_s21, 1792, %s6844_s10, [#allocation3], %s5288_s2, %s5288_s2, %s5289_s29  }
 0x58a   :  { %5278 = dma.done.wait [#allocation3], 1792  }
 0x58b   :  { %5279 = vsyncadd [#allocation3], 4294965504 }
 0x58c   :  { %5280 = dma.done.wait [#allocation5], 256  }
 0x58d   :  { %5281 = vsyncadd [#allocation5], 4294967040 }
 0x58e   :  { %3950 = vsyncpa [#allocation3], 1 }
 0x58f   :  { %3951 = vsyncpa [#allocation5], 1 }

</bundles_post_ra>
